<compile_context>
chip_gen: v7x
topology: tpu7x:2x2x1
jax: 0.10.0
libtpu: 0.0.40
codegen_flags: <defaults>
</compile_context>

<pallas_src>
import functools

import numpy as np
import jax
import jax.numpy as jnp
from jax import lax
from jax.experimental import pallas as pl
from jax.experimental.pallas import tpu as pltpu


def _scatter_kernel(blk_ref, feat_a_ref, feat_b_ref, key_a_ref, key_b_ref,
                    out_ref, *, n_cells):
    """One (batch b, output-tile j) grid point.

    feat_{a,b}_ref : (Cpad, WP) f32  -- two consecutive windows of the sorted,
                                        transposed pillar features
    key_{a,b}_ref  : (WP, 1)   i32   -- matching windows of the sorted keys
                                        (key = batch_id * n_cells + flat_idx)
    out_ref        : (1, Cpad, TILE_N) f32
    """
    b = pl.program_id(0)
    j = pl.program_id(1)
    tile_n = out_ref.shape[-1]
    wp = key_a_ref.shape[0]

    tile_col0 = j * tile_n
    tile_base = b * n_cells + tile_col0

    col = lax.broadcasted_iota(jnp.int32, (wp, tile_n), 1)
    # Columns past n_cells are padding of the last tile; masking them also
    # rejects pillars of batch b+1 and the sentinel-key padding pillars that
    # may sit inside the window.
    col_valid = (lax.broadcasted_iota(jnp.int32, (1, tile_n), 1)
                 + tile_col0) < n_cells

    sel_a = ((key_a_ref[...] - tile_base) == col) & col_valid
    sel_b = ((key_b_ref[...] - tile_base) == col) & col_valid

    acc = jnp.dot(feat_a_ref[...], sel_a.astype(jnp.float32),
                  preferred_element_type=jnp.float32)
    acc = acc + jnp.dot(feat_b_ref[...], sel_b.astype(jnp.float32),
                        preferred_element_type=jnp.float32)
    out_ref[...] = acc[None].astype(out_ref.dtype)


@functools.partial(jax.jit,
                   static_argnames=("batch_size", "n_cells", "tile_n"))
def pillar_scatter_pallas(feat, batch_ids, flat_idx, *, batch_size, n_cells,
                          tile_n=512):
    """feat: (P, C) f32, batch_ids/flat_idx: (P,) int -> (B, C, n_cells) f32.

    Note: P is baked into the compiled shape; callers should pad P to a small
    set of bucket sizes to avoid per-frame recompiles.
    """
    assert tile_n % 128 == 0 and tile_n >= 128
    P, C = feat.shape
    cpad = max(8, ((C + 7) // 8) * 8)

    # --- wrapper-side prep (static shapes, jit-friendly) --------------------
    key = (batch_ids.astype(jnp.int32) * n_cells
           + flat_idx.astype(jnp.int32))                       # (P,)
    order = jnp.argsort(key)
    sorted_key = jnp.take(key, order)                          # (P,)
    sorted_feat = jnp.take(feat, order, axis=0)                # (P, C)

    wp = tile_n                                # pillar window block size
    num_blocks = (P + wp - 1) // wp + 1        # +1 guard block, always >= 2
    ppad = num_blocks * wp

    feat_t = jnp.zeros((cpad, ppad), feat.dtype).at[:C, :P].set(sorted_feat.T)
    key_col = jnp.full((ppad, 1), 2 ** 30, dtype=jnp.int32)
    key_col = key_col.at[:P, 0].set(sorted_key)

    n_cells_pad = ((n_cells + tile_n - 1) // tile_n) * tile_n
    n_tiles = n_cells_pad // tile_n

    # Per (b, j) tile: first sorted-pillar position whose key >= tile base.
    tile_bases = (jnp.arange(batch_size, dtype=jnp.int32)[:, None] * n_cells
                  + jnp.arange(n_tiles, dtype=jnp.int32)[None, :] * tile_n)
    starts = jnp.searchsorted(sorted_key, tile_bases.reshape(-1))
    blk = jnp.minimum(starts // wp, num_blocks - 2).astype(jnp.int32)

    # index_maps (scalar-prefetch ref is passed positionally last)
    def feat_a_map(b, j, blk_r): return (0, blk_r[b * n_tiles + j])
    def feat_b_map(b, j, blk_r): return (0, blk_r[b * n_tiles + j] + 1)
    def key_a_map(b, j, blk_r): return (blk_r[b * n_tiles + j], 0)
    def key_b_map(b, j, blk_r): return (blk_r[b * n_tiles + j] + 1, 0)
    def out_map(b, j, blk_r): return (b, 0, j)

    out = pl.pallas_call(
        functools.partial(_scatter_kernel, n_cells=n_cells),
        out_shape=jax.ShapeDtypeStruct((batch_size, cpad, n_cells_pad),
                                       feat.dtype),
        grid_spec=pltpu.PrefetchScalarGridSpec(
            num_scalar_prefetch=1,
            grid=(batch_size, n_tiles),
            in_specs=[
                pl.BlockSpec((cpad, wp), feat_a_map),
                pl.BlockSpec((cpad, wp), feat_b_map),
                pl.BlockSpec((wp, 1), key_a_map),
                pl.BlockSpec((wp, 1), key_b_map),
            ],
            out_specs=pl.BlockSpec((1, cpad, tile_n), out_map),
        ),
        compiler_params=pltpu.CompilerParams(
            dimension_semantics=("parallel", "parallel")),
    )(blk, feat_t, feat_t, key_col, key_col)
    return out[:, :C, :n_cells]


def point_pillar_scatter_forward(batch_dict, *, nx, ny, nz, batch_size=None,
                                 train_bev_shape=False, tile_n=512):
    assert nz == 1
    pillar_features = batch_dict['pillar_features']            # (P, 64) f32
    coords = batch_dict['voxel_coords']                        # (P, 4)  int
    n_cells = nz * nx * ny

    if batch_size is None:
        # Fallback mirroring the PyTorch .item(); prefer passing batch_size
        # statically from config to avoid a host sync + per-frame recompile.
        batch_size = int(np.asarray(coords[:, 0]).max()) + 1

    flat_idx = coords[:, 1] + coords[:, 2] * nx + coords[:, 3]
    sp = pillar_scatter_pallas(pillar_features, coords[:, 0], flat_idx,
                               batch_size=batch_size, n_cells=n_cells,
                               tile_n=tile_n)
    batch_dict['spatial_features'] = sp.reshape(batch_size, 64 * nz, ny, nx)

    if train_bev_shape:
        # TODO(synk): fuse the four 1-channel bm_* scatters into one
        # pallas_call (4 one-hot feature channels) if per-call overhead shows
        # up in profiles.
        for prefix in ('bm', 'c_bm', 'p_bm', 'cy_bm'):
            voxels = batch_dict[f'{prefix}_voxels']
            bm_coords = batch_dict[f'{prefix}_voxel_coords']
            ones_feat = jnp.ones((voxels.shape[0], 1), pillar_features.dtype)
            batch_dict[f'{prefix}_pillar_features'] = ones_feat
            bm_idx = bm_coords[:, 1] + bm_coords[:, 2] * nx + bm_coords[:, 3]
            bm_sp = pillar_scatter_pallas(ones_feat, bm_coords[:, 0], bm_idx,
                                          batch_size=batch_size,
                                          n_cells=n_cells, tile_n=tile_n)
            batch_dict[f'{prefix}_spatial_features'] = bm_sp.reshape(
                batch_size, 1 * nz, ny, nx)
    return batch_dict


def _reference_scatter(feat, coords, batch_size, nx, ny, nz, n_chan):
    """Pure-numpy reference reproducing the PyTorch loop."""
    feat = np.asarray(feat)
    coords = np.asarray(coords)
    n_cells = nz * nx * ny
    outs = []
    for b in range(batch_size):
        sf = np.zeros((n_chan, n_cells), dtype=feat.dtype)
        m = coords[:, 0] == b
        tc = coords[m]
        idx = (tc[:, 1] + tc[:, 2] * nx + tc[:, 3]).astype(np.int64)
        sf[:, idx] = feat[m].T
        outs.append(sf)
    out = np.stack(outs, 0).reshape(batch_size, n_chan * nz, ny, nx)
    return out


if __name__ == "__main__":
    key = jax.random.PRNGKey(0)
    B, C = 2, 64
    nx, ny, nz = 16, 16, 1
    N = nz * nx * ny
    pillars_per_batch = 20

    # Deterministic coords with unique flat indices per batch element.
    coords_list, keys = [], jax.random.split(key, B + 1)
    for b in range(B):
        flat = jax.random.choice(keys[b], N, (pillars_per_batch,), replace=False)
        flat = flat.astype(jnp.int32)
        c1 = flat % nx            # so that c1 + c2*nx + c3 == flat
        c2 = flat // nx
        c3 = jnp.zeros_like(flat)
        bcol = jnp.full_like(flat, b)
        coords_list.append(jnp.stack([bcol, c1, c2, c3], axis=1))
    coords = jnp.concatenate(coords_list, axis=0)                  # (P, 4)
    P = coords.shape[0]
    pillar_features = jax.random.normal(keys[-1], (P, C), jnp.float32)

    # Small aux inputs for the train_bev_shape branch (same kernel, C=1).
    bm_coords = coords[::4]
    batch_dict = {
        'pillar_features': pillar_features,
        'voxel_coords': coords,
        'bm_voxels': jnp.zeros((bm_coords.shape[0], 1), jnp.float32),
        'bm_voxel_coords': bm_coords,
        'c_bm_voxels': jnp.zeros((bm_coords.shape[0], 1), jnp.float32),
        'c_bm_voxel_coords': bm_coords,
        'p_bm_voxels': jnp.zeros((bm_coords.shape[0], 1), jnp.float32),
        'p_bm_voxel_coords': bm_coords,
        'cy_bm_voxels': jnp.zeros((bm_coords.shape[0], 1), jnp.float32),
        'cy_bm_voxel_coords': bm_coords,
    }

    out_dict = point_pillar_scatter_forward(
        batch_dict, nx=nx, ny=ny, nz=nz, batch_size=B, train_bev_shape=True)

    sp = jax.block_until_ready(out_dict['spatial_features'])
    bm = jax.block_until_ready(out_dict['bm_spatial_features'])

    # Verify against a numpy reference of the PyTorch loop.
    ref_sp = _reference_scatter(pillar_features, coords, B, nx, ny, nz, 64)
    np.testing.assert_allclose(np.asarray(sp), ref_sp, rtol=1e-6, atol=1e-6)
    ref_bm = _reference_scatter(np.ones((bm_coords.shape[0], 1), np.float32),
                                bm_coords, B, nx, ny, nz, 1)
    np.testing.assert_allclose(np.asarray(bm), ref_bm, rtol=1e-6, atol=1e-6)

    assert sp.shape == (B, 64 * nz, ny, nx) and sp.dtype == jnp.float32
    assert bm.shape == (B, 1 * nz, ny, nx)
    print("KERNEL_OK")
</pallas_src>

<mosaic_0001>
module attributes {stable_mosaic.version = 11 : i64} {
  func.func @_scatter_kernel(%arg0: i32, %arg1: i32, %arg2: memref<2xi32, #tpu.memory_space<smem>>, %arg3: memref<64x512xf32, #tpu.memory_space<vmem>>, %arg4: memref<64x512xf32, #tpu.memory_space<vmem>>, %arg5: memref<512x1xi32, #tpu.memory_space<vmem>>, %arg6: memref<512x1xi32, #tpu.memory_space<vmem>>, %arg7: memref<1x64x512xf32, #tpu.memory_space<vmem>>) attributes {dimension_semantics = [#tpu.dimension_semantics<parallel>, #tpu.dimension_semantics<parallel>], iteration_bounds = array<i64: 2, 1>, scalar_prefetch = 1 : i64, scratch_operands = 0 : i64, tpu.core_type = #tpu.core_type<tc>, window_params = [{transform_indices = @transform_0, window_bounds = array<i64: 64, 512>}, {transform_indices = @transform_1, window_bounds = array<i64: 64, 512>}, {transform_indices = @transform_2, window_bounds = array<i64: 512, 1>}, {transform_indices = @transform_3, window_bounds = array<i64: 512, 1>}, {transform_indices = @transform_4, window_bounds = array<i64: 1, 64, 512>}]} {
    %c512_i32 = arith.constant 512 : i32
    %0 = arith.muli %arg1, %c512_i32 : i32
    %c256_i32 = arith.constant 256 : i32
    %1 = arith.muli %arg0, %c256_i32 : i32
    %2 = arith.addi %1, %0 : i32
    %3 = tpu.iota {dimensions = array<i32: 1>} : vector<512x512xi32>
    %4 = tpu.iota {dimensions = array<i32: 1>} : vector<1x512xi32>
    %5 = vector.broadcast %0 : i32 to vector<1x512xi32>
    %6 = arith.addi %4, %5 : vector<1x512xi32>
    %c256_i32_0 = arith.constant 256 : i32
    %7 = vector.broadcast %c256_i32_0 : i32 to vector<1x512xi32>
    %8 = arith.cmpi slt, %6, %7 : vector<1x512xi32>
    %c0 = arith.constant 0 : index
    %c0_1 = arith.constant 0 : index
    %9 = vector.load %arg5[%c0, %c0_1] : memref<512x1xi32, #tpu.memory_space<vmem>>, vector<512x1xi32>
    %10 = vector.broadcast %2 : i32 to vector<512x1xi32>
    %11 = arith.subi %9, %10 : vector<512x1xi32>
    %12 = vector.broadcast %11 : vector<512x1xi32> to vector<512x512xi32>
    %13 = arith.cmpi eq, %12, %3 : vector<512x512xi32>
    %14 = vector.broadcast %8 : vector<1x512xi1> to vector<512x512xi1>
    %15 = arith.andi %13, %14 : vector<512x512xi1>
    %c0_2 = arith.constant 0 : index
    %c0_3 = arith.constant 0 : index
    %16 = vector.load %arg6[%c0_2, %c0_3] : memref<512x1xi32, #tpu.memory_space<vmem>>, vector<512x1xi32>
    %17 = vector.broadcast %2 : i32 to vector<512x1xi32>
    %18 = arith.subi %16, %17 : vector<512x1xi32>
    %19 = vector.broadcast %18 : vector<512x1xi32> to vector<512x512xi32>
    %20 = arith.cmpi eq, %19, %3 : vector<512x512xi32>
    %21 = vector.broadcast %8 : vector<1x512xi1> to vector<512x512xi1>
    %22 = arith.andi %20, %21 : vector<512x512xi1>
    %c0_4 = arith.constant 0 : index
    %c0_5 = arith.constant 0 : index
    %23 = vector.load %arg3[%c0_4, %c0_5] : memref<64x512xf32, #tpu.memory_space<vmem>>, vector<64x512xf32>
    %24 = arith.extui %15 : vector<512x512xi1> to vector<512x512xi32>
    %25 = arith.sitofp %24 : vector<512x512xi32> to vector<512x512xf32>
    %cst = arith.constant dense<0.000000e+00> : vector<64x512xf32>
    %26 = tpu.matmul %23, %25, %cst {dimension_numbers = #tpu.dot_dimension_numbers<[1], [0], [0], [1], [0, 0, 1, 1], [], []>} : vector<64x512xf32>, vector<512x512xf32>, vector<64x512xf32> -> vector<64x512xf32>
    %c0_6 = arith.constant 0 : index
    %c0_7 = arith.constant 0 : index
    %27 = vector.load %arg4[%c0_6, %c0_7] : memref<64x512xf32, #tpu.memory_space<vmem>>, vector<64x512xf32>
    %28 = arith.extui %22 : vector<512x512xi1> to vector<512x512xi32>
    %29 = arith.sitofp %28 : vector<512x512xi32> to vector<512x512xf32>
    %cst_8 = arith.constant dense<0.000000e+00> : vector<64x512xf32>
    %30 = tpu.matmul %27, %29, %cst_8 {dimension_numbers = #tpu.dot_dimension_numbers<[1], [0], [0], [1], [0, 0, 1, 1], [], []>} : vector<64x512xf32>, vector<512x512xf32>, vector<64x512xf32> -> vector<64x512xf32>
    %31 = arith.addf %26, %30 : vector<64x512xf32>
    %32 = vector.shape_cast %31 : vector<64x512xf32> to vector<1x64x512xf32>
    %c0_9 = arith.constant 0 : index
    %c0_10 = arith.constant 0 : index
    %c0_11 = arith.constant 0 : index
    %33 = vector.load %arg7[%c0_9, %c0_10, %c0_11] : memref<1x64x512xf32, #tpu.memory_space<vmem>>, vector<1x64x512xf32>
    tpu.vector_store %arg7[%c0_9, %c0_10, %c0_11], %32 {strides = array<i32>} : memref<1x64x512xf32, #tpu.memory_space<vmem>>, vector<1x64x512xf32>,
    return
  }
  func.func @transform_0(%arg0: i32, %arg1: i32, %arg2: memref<2xi32, #tpu.memory_space<smem>>) -> (i32, i32) {
    %c1_i32 = arith.constant 1 : i32
    %0 = arith.muli %arg0, %c1_i32 : i32
    %1 = arith.addi %0, %arg1 : i32
    %2 = arith.index_cast %1 : i32 to index
    %3 = memref.load %arg2[%2] : memref<2xi32, #tpu.memory_space<smem>>
    %c0_i32 = arith.constant 0 : i32
    %c0_i32_0 = arith.constant 0 : i32
    return %c0_i32, %3 : i32, i32
  }
  func.func @transform_1(%arg0: i32, %arg1: i32, %arg2: memref<2xi32, #tpu.memory_space<smem>>) -> (i32, i32) {
    %c1_i32 = arith.constant 1 : i32
    %0 = arith.muli %arg0, %c1_i32 : i32
    %1 = arith.addi %0, %arg1 : i32
    %2 = arith.index_cast %1 : i32 to index
    %3 = memref.load %arg2[%2] : memref<2xi32, #tpu.memory_space<smem>>
    %c1_i32_0 = arith.constant 1 : i32
    %4 = arith.addi %3, %c1_i32_0 : i32
    %c0_i32 = arith.constant 0 : i32
    %c0_i32_1 = arith.constant 0 : i32
    return %c0_i32, %4 : i32, i32
  }
  func.func @transform_2(%arg0: i32, %arg1: i32, %arg2: memref<2xi32, #tpu.memory_space<smem>>) -> (i32, i32) {
    %c1_i32 = arith.constant 1 : i32
    %0 = arith.muli %arg0, %c1_i32 : i32
    %1 = arith.addi %0, %arg1 : i32
    %2 = arith.index_cast %1 : i32 to index
    %3 = memref.load %arg2[%2] : memref<2xi32, #tpu.memory_space<smem>>
    %c0_i32 = arith.constant 0 : i32
    %c0_i32_0 = arith.constant 0 : i32
    return %3, %c0_i32 : i32, i32
  }
  func.func @transform_3(%arg0: i32, %arg1: i32, %arg2: memref<2xi32, #tpu.memory_space<smem>>) -> (i32, i32) {
    %c1_i32 = arith.constant 1 : i32
    %0 = arith.muli %arg0, %c1_i32 : i32
    %1 = arith.addi %0, %arg1 : i32
    %2 = arith.index_cast %1 : i32 to index
    %3 = memref.load %arg2[%2] : memref<2xi32, #tpu.memory_space<smem>>
    %c1_i32_0 = arith.constant 1 : i32
    %4 = arith.addi %3, %c1_i32_0 : i32
    %c0_i32 = arith.constant 0 : i32
    %c0_i32_1 = arith.constant 0 : i32
    return %4, %c0_i32 : i32, i32
  }
  func.func @transform_4(%arg0: i32, %arg1: i32, %arg2: memref<2xi32, #tpu.memory_space<smem>>) -> (i32, i32, i32) {
    %c0_i32 = arith.constant 0 : i32
    %c0_i32_0 = arith.constant 0 : i32
    return %arg0, %c0_i32, %arg1 : i32, i32, i32
  }
}

</mosaic_0001>

<bundles_post_ra>
// kernel: custom-call.1
= control target key start
LH: loop header
LB: loop body
LE: loop exit
PB: predicated region body
PF: predicated region fallthrough
CT: control target
= control target key end

     0   :  { %s6_s0 = inlined_call_operand.vmem [shape: u32[2], index: 0, kind: output, shape index: {}]  }

// kernel: pillar_scatter_pallas.1
= control target key start
LH: loop header
LB: loop body
LE: loop exit
PB: predicated region body
PF: predicated region fallthrough
CT: control target
= control target key end

     0   :  { %s6688_s0 = inlined_call_operand.vmem [shape: s32[2], index: 0, kind: input, shape index: {}]   ;;  %s6689_s1 = inlined_call_operand.vmem [shape: f32[64,1024], index: 1, kind: input, shape index: {}, may-alias: {1,2}]   ;;  %s6690_s2 = inlined_call_operand.vmem [shape: f32[64,1024], index: 2, kind: input, shape index: {}, may-alias: {1,2}]   ;;  %s6691_s3 = inlined_call_operand.vmem [shape: s32[1024,1], index: 3, kind: input, shape index: {}, may-alias: {3,4}]   ;;  %s6692_s4 = inlined_call_operand.vmem [shape: s32[1024,1], index: 4, kind: input, shape index: {}, may-alias: {3,4}]   ;;  %s6693_s5 = inlined_call_operand.vmem [shape: f32[2,64,512], index: 5, kind: output, shape index: {}]  }
   0x1   :  { %s10_s20 = sshll.u32 %s6688_s0, 4  ;;  %s11_s20 = int_to_ptr.vmem [resolvable:$true] %s10_s20 }
   0x2   :  { %s5342_s21 = scalar_lea.vmem %s11_s20, 16  ;;  %p5347_p1 = scmp.lt.s32.totalorder %s11_s20, %s11_s20 }
   0x3   :  { %p5343_p0 = scmp.ne.s32.totalorder %s11_s20, %s5342_s21  ;;  %p5348_p2 = scmp.lt.s32.totalorder %s5342_s21, %s5342_s21 }
   0x5   :  { %p5349_p3 = por %p5348_p2, %p5347_p1 }
   0x7   :  { %p5350_p4 = pnand %p5349_p3, %p5343_p0 }
   0x9   :  { %5353 = shalt.err (!%p5350_p4)  }
   0xa   :  { %s5412_s22 = smov [#allocation3]  }
   0xb   :  { %13 = dma.vmem_to_smem %s11_s20, 16, %s5412_s22, [#allocation2] }
   0xc   :  { %5382 = dma.done.wait [#allocation2], 16 }
   0xd   :  { %5383 = vsyncadd [#allocation2], 4294967280 }
   0xe   :  { %15 = sfence }
   0xf   :  { %s5449_s23 = smov 0   ;;  %s5451_s24 = smov 0  }
  0x10   :  { %s5453_s25 = smov 0   ;;  %s5455_s0 = smov 0  }
  0x11   :  { %s5457_s26 = smov 0   ;;  %s5459_s27 = smov 0  }
  0x12   :  { %s5461_s28 = smov 0  }
  0x13 LB: > { %s33_s29 = sadd.s32 1, %s5406_s27  ;;  %s38_s30 = sld [smem:[#allocation3 + %s5406_s27]]  ;;  %s5410_s28 = sphi %s5461_s28, %s21_s28   ;;  %s5406_s27 = sphi %s5459_s27, %s6701_s27   ;;  %s5402_s26 = sphi %s5457_s26, %s6700_s26   ;;  %s5398_s0 = sphi %s5455_s0, %s6699_s0   ;;  %s5394_s25 = sphi %s5453_s25, %s6698_s25   ;;  %s5390_s24 = sphi %s5451_s24, %s6697_s24   ;;  %s5386_s23 = sphi %s5449_s23, %s6696_s23  }
  0x14   : > { %p35_p5 = scmp.ge.s32.totalorder %s33_s29, 2  ;;  %p51_p6 = scmp.ne.s32.totalorder %s5398_s0, %s5394_s25 }
  0x15   : > { %p52_p7 = scmp.eq.s32.totalorder %s5410_s28, 0  ;;  %s68_s7 = sld [smem:[#allocation3 + %s5406_s27]] }
  0x16   : > { %s6703_s29 = smov (%p35_p5, %s33_s29), 0  ;;  %p83_p9 = scmp.ne.s32.totalorder %s5390_s24, %s5386_s23 }
  0x17   : > { %p5491_p8 = por %p52_p7, %p51_p6  ;;  %s40_s8 = sld [smem:[#allocation3 + %s6703_s29]] }
  0x18   : > { %s71_s9 = sld [smem:[#allocation3 + %s6703_s29]]  ;;  %p5500_p10 = por %p83_p9, %p52_p7 }
  0x19   : > { %s44_s11 = sadd.s32 1, %s5398_s0  ;;  %s76_s13 = sadd.s32 1, %s5390_s24 }
  0x1a   : > { %p4360_p13 = scmp.ge.s32.totalorder %s5410_s28, 2 }
  0x1b   : > { %s69_s12 = sadd.s32 1, %s68_s7 }
  0x1c   : > { %199 = sbr.rel (%p4360_p13) target bundleno = 87 (0x57), region = 16 }
  0x1d   : > { %s41_s14 = ssub.s32 %s38_s30, %s40_s8 }
  0x1e   : > { %s72_s15 = sadd.s32 1, %s71_s9  ;;  %p42_p11 = scmp.eq.s32.totalorder %s41_s14, 0 }
  0x1f   : > { %s73_s16 = ssub.s32 %s69_s12, %s72_s15 }
  0x20   : > { %p74_p12 = scmp.eq.s32.totalorder %s73_s16, 0 }
  0x21   : > { %s5507_s17 = scalar_select %p42_p11, %s5398_s0, %s44_s11  }
  0x22   : > { %s5510_s18 = scalar_select %p74_p12, %s5390_s24, %s76_s13  }
  0x23   : > { %202 = sbr.rel (!%p5491_p8) target bundleno = 61 (0x3d), region = 20  ;;  %s204_s19 = sand.u32 (%p5491_p8), 1, %s5398_s0  }
  0x24   : > { %s208_s20 = sld [smem:[#allocation3 + %s5406_s27]] (%p5491_p8)  ;;  %s4361_s21 = sshll.u32 (%p5491_p8), %s204_s19, 8 }
  0x25   : > { %s5525_s6 = scalar_lea.vmem (%p5491_p8), [#allocation4], %s4361_s21 }
  0x2a   : > { %s4922_s22 = sshll.u32 %s208_s20, 5 }
  0x2b   : > { %s5520_s8 = scalar_lea.vmem %s6689_s1, %s4922_s22 }
  0x2c   : > { %v224_v0 = vld [vmem:[%s5520_s8] sm:$0xff]  ;;  %v226_v1 = vld [vmem:[%s5520_s8 + $0x8] sm:$0xff]  ;;  %v228_v2 = vld [vmem:[%s5520_s8 + $0x10] sm:$0xff] }
  0x2d   : > { %225 = vst [vmem:[%s5525_s6] sm:$0xff] %v224_v0  ;;  %227 = vst [vmem:[%s5525_s6 + $0x8] sm:$0xff] %v226_v1  ;;  %v230_v3 = vld [vmem:[%s5520_s8 + $0x18] sm:$0xff]  ;;  %v232_v4 = vld [vmem:[%s5520_s8 + $0x40] sm:$0xff] }
  0x2e   : > { %229 = vst [vmem:[%s5525_s6 + $0x10] sm:$0xff] %v228_v2  ;;  %v234_v5 = vld [vmem:[%s5520_s8 + $0x48] sm:$0xff]  ;;  %231 = vst [vmem:[%s5525_s6 + $0x18] sm:$0xff] %v230_v3  ;;  %v236_v6 = vld [vmem:[%s5520_s8 + $0x50] sm:$0xff] }
  0x2f   : > { %233 = vst [vmem:[%s5525_s6 + $0x20] sm:$0xff] %v232_v4  ;;  %235 = vst [vmem:[%s5525_s6 + $0x28] sm:$0xff] %v234_v5  ;;  %v238_v7 = vld [vmem:[%s5520_s8 + $0x58] sm:$0xff]  ;;  %v240_v8 = vld [vmem:[%s5520_s8 + $0x80] sm:$0xff] }
  0x30   : > { %237 = vst [vmem:[%s5525_s6 + $0x30] sm:$0xff] %v236_v6  ;;  %239 = vst [vmem:[%s5525_s6 + $0x38] sm:$0xff] %v238_v7  ;;  %v242_v9 = vld [vmem:[%s5520_s8 + $0x88] sm:$0xff]  ;;  %v244_v10 = vld [vmem:[%s5520_s8 + $0x90] sm:$0xff] }
  0x31   : > { %241 = vst [vmem:[%s5525_s6 + $0x40] sm:$0xff] %v240_v8  ;;  %v246_v11 = vld [vmem:[%s5520_s8 + $0x98] sm:$0xff]  ;;  %243 = vst [vmem:[%s5525_s6 + $0x48] sm:$0xff] %v242_v9  ;;  %v248_v12 = vld [vmem:[%s5520_s8 + $0xc0] sm:$0xff] }
  0x32   : > { %245 = vst [vmem:[%s5525_s6 + $0x50] sm:$0xff] %v244_v10  ;;  %247 = vst [vmem:[%s5525_s6 + $0x58] sm:$0xff] %v246_v11  ;;  %v250_v13 = vld [vmem:[%s5520_s8 + $0xc8] sm:$0xff]  ;;  %v252_v14 = vld [vmem:[%s5520_s8 + $0xd0] sm:$0xff] }
  0x33   : > { %249 = vst [vmem:[%s5525_s6 + $0x60] sm:$0xff] %v248_v12  ;;  %251 = vst [vmem:[%s5525_s6 + $0x68] sm:$0xff] %v250_v13  ;;  %v254_v15 = vld [vmem:[%s5520_s8 + $0xd8] sm:$0xff]  ;;  %v256_v16 = vld [vmem:[%s5520_s8 + $0x100] sm:$0xff] }
  0x34   : > { %253 = vst [vmem:[%s5525_s6 + $0x70] sm:$0xff] %v252_v14  ;;  %v258_v17 = vld [vmem:[%s5520_s8 + $0x108] sm:$0xff]  ;;  %255 = vst [vmem:[%s5525_s6 + $0x78] sm:$0xff] %v254_v15  ;;  %v260_v18 = vld [vmem:[%s5520_s8 + $0x110] sm:$0xff] }
  0x35   : > { %257 = vst [vmem:[%s5525_s6 + $0x80] sm:$0xff] %v256_v16  ;;  %259 = vst [vmem:[%s5525_s6 + $0x88] sm:$0xff] %v258_v17  ;;  %v262_v19 = vld [vmem:[%s5520_s8 + $0x118] sm:$0xff]  ;;  %v264_v20 = vld [vmem:[%s5520_s8 + $0x140] sm:$0xff] }
  0x36   : > { %261 = vst [vmem:[%s5525_s6 + $0x90] sm:$0xff] %v260_v18  ;;  %263 = vst [vmem:[%s5525_s6 + $0x98] sm:$0xff] %v262_v19  ;;  %v266_v21 = vld [vmem:[%s5520_s8 + $0x148] sm:$0xff]  ;;  %v268_v22 = vld [vmem:[%s5520_s8 + $0x150] sm:$0xff] }
  0x37   : > { %265 = vst [vmem:[%s5525_s6 + $0xa0] sm:$0xff] %v264_v20  ;;  %v270_v23 = vld [vmem:[%s5520_s8 + $0x158] sm:$0xff]  ;;  %267 = vst [vmem:[%s5525_s6 + $0xa8] sm:$0xff] %v266_v21  ;;  %v272_v24 = vld [vmem:[%s5520_s8 + $0x180] sm:$0xff] }
  0x38   : > { %269 = vst [vmem:[%s5525_s6 + $0xb0] sm:$0xff] %v268_v22  ;;  %271 = vst [vmem:[%s5525_s6 + $0xb8] sm:$0xff] %v270_v23  ;;  %v274_v25 = vld [vmem:[%s5520_s8 + $0x188] sm:$0xff]  ;;  %v276_v26 = vld [vmem:[%s5520_s8 + $0x190] sm:$0xff] }
  0x39   : > { %273 = vst [vmem:[%s5525_s6 + $0xc0] sm:$0xff] %v272_v24  ;;  %275 = vst [vmem:[%s5525_s6 + $0xc8] sm:$0xff] %v274_v25  ;;  %v278_v27 = vld [vmem:[%s5520_s8 + $0x198] sm:$0xff]  ;;  %v280_v28 = vld [vmem:[%s5520_s8 + $0x1c0] sm:$0xff] }
  0x3a   : > { %277 = vst [vmem:[%s5525_s6 + $0xd0] sm:$0xff] %v276_v26  ;;  %v282_v29 = vld [vmem:[%s5520_s8 + $0x1c8] sm:$0xff]  ;;  %279 = vst [vmem:[%s5525_s6 + $0xd8] sm:$0xff] %v278_v27  ;;  %v284_v30 = vld [vmem:[%s5520_s8 + $0x1d0] sm:$0xff] }
  0x3b   : > { %281 = vst [vmem:[%s5525_s6 + $0xe0] sm:$0xff] %v280_v28  ;;  %283 = vst [vmem:[%s5525_s6 + $0xe8] sm:$0xff] %v282_v29  ;;  %v286_v31 = vld [vmem:[%s5520_s8 + $0x1d8] sm:$0xff] }
  0x3c   : > { %285 = vst [vmem:[%s5525_s6 + $0xf0] sm:$0xff] %v284_v30  ;;  %287 = vst [vmem:[%s5525_s6 + $0xf8] sm:$0xff] %v286_v31 }
  0x3d PF: > { %293 = sbr.rel (!%p5500_p10) target bundleno = 87 (0x57), region = 43  ;;  %s295_s9 = sand.u32 (%p5500_p10), 1, %s5390_s24  }
  0x3e   : > { %s299_s11 = sld [smem:[#allocation3 + %s5406_s27]] (%p5500_p10)  ;;  %s4364_s12 = sshll.u32 (%p5500_p10), %s295_s9, 8 }
  0x3f   : > { %s5600_s10 = scalar_lea.vmem (%p5500_p10), [#allocation5], %s4364_s12 }
  0x44   : > { %s4365_s13 = sshll.u32 %s299_s11, 5 }
  0x45   : > { %s5595_s16 = scalar_lea.vmem %s6690_s2, %s4365_s13 }
  0x46   : > { %v4366_v32 = vld [vmem:[%s5595_s16 + $0x20] sm:$0xff]  ;;  %v4367_v33 = vld [vmem:[%s5595_s16 + $0x28] sm:$0xff]  ;;  %v4368_v34 = vld [vmem:[%s5595_s16 + $0x30] sm:$0xff] }
  0x47   : > { %317 = vst [vmem:[%s5600_s10] sm:$0xff] %v4366_v32  ;;  %319 = vst [vmem:[%s5600_s10 + $0x8] sm:$0xff] %v4367_v33  ;;  %v4369_v35 = vld [vmem:[%s5595_s16 + $0x38] sm:$0xff]  ;;  %v4370_v36 = vld [vmem:[%s5595_s16 + $0x60] sm:$0xff] }
  0x48   : > { %321 = vst [vmem:[%s5600_s10 + $0x10] sm:$0xff] %v4368_v34  ;;  %v4371_v37 = vld [vmem:[%s5595_s16 + $0x68] sm:$0xff]  ;;  %323 = vst [vmem:[%s5600_s10 + $0x18] sm:$0xff] %v4369_v35  ;;  %v4372_v38 = vld [vmem:[%s5595_s16 + $0x70] sm:$0xff] }
  0x49   : > { %325 = vst [vmem:[%s5600_s10 + $0x20] sm:$0xff] %v4370_v36  ;;  %327 = vst [vmem:[%s5600_s10 + $0x28] sm:$0xff] %v4371_v37  ;;  %v4373_v39 = vld [vmem:[%s5595_s16 + $0x78] sm:$0xff]  ;;  %v4374_v40 = vld [vmem:[%s5595_s16 + $0xa0] sm:$0xff] }
  0x4a   : > { %329 = vst [vmem:[%s5600_s10 + $0x30] sm:$0xff] %v4372_v38  ;;  %331 = vst [vmem:[%s5600_s10 + $0x38] sm:$0xff] %v4373_v39  ;;  %v4375_v41 = vld [vmem:[%s5595_s16 + $0xa8] sm:$0xff]  ;;  %v4376_v42 = vld [vmem:[%s5595_s16 + $0xb0] sm:$0xff] }
  0x4b   : > { %333 = vst [vmem:[%s5600_s10 + $0x40] sm:$0xff] %v4374_v40  ;;  %v4377_v43 = vld [vmem:[%s5595_s16 + $0xb8] sm:$0xff]  ;;  %335 = vst [vmem:[%s5600_s10 + $0x48] sm:$0xff] %v4375_v41  ;;  %v4378_v44 = vld [vmem:[%s5595_s16 + $0xe0] sm:$0xff] }
  0x4c   : > { %337 = vst [vmem:[%s5600_s10 + $0x50] sm:$0xff] %v4376_v42  ;;  %339 = vst [vmem:[%s5600_s10 + $0x58] sm:$0xff] %v4377_v43  ;;  %v4379_v45 = vld [vmem:[%s5595_s16 + $0xe8] sm:$0xff]  ;;  %v4380_v46 = vld [vmem:[%s5595_s16 + $0xf0] sm:$0xff] }
  0x4d   : > { %341 = vst [vmem:[%s5600_s10 + $0x60] sm:$0xff] %v4378_v44  ;;  %343 = vst [vmem:[%s5600_s10 + $0x68] sm:$0xff] %v4379_v45  ;;  %v4381_v47 = vld [vmem:[%s5595_s16 + $0xf8] sm:$0xff]  ;;  %v4382_v48 = vld [vmem:[%s5595_s16 + $0x120] sm:$0xff] }
  0x4e   : > { %345 = vst [vmem:[%s5600_s10 + $0x70] sm:$0xff] %v4380_v46  ;;  %v4383_v49 = vld [vmem:[%s5595_s16 + $0x128] sm:$0xff]  ;;  %347 = vst [vmem:[%s5600_s10 + $0x78] sm:$0xff] %v4381_v47  ;;  %v4384_v50 = vld [vmem:[%s5595_s16 + $0x130] sm:$0xff] }
  0x4f   : > { %349 = vst [vmem:[%s5600_s10 + $0x80] sm:$0xff] %v4382_v48  ;;  %351 = vst [vmem:[%s5600_s10 + $0x88] sm:$0xff] %v4383_v49  ;;  %v4385_v51 = vld [vmem:[%s5595_s16 + $0x138] sm:$0xff]  ;;  %v4386_v52 = vld [vmem:[%s5595_s16 + $0x160] sm:$0xff] }
  0x50   : > { %353 = vst [vmem:[%s5600_s10 + $0x90] sm:$0xff] %v4384_v50  ;;  %355 = vst [vmem:[%s5600_s10 + $0x98] sm:$0xff] %v4385_v51  ;;  %v4387_v53 = vld [vmem:[%s5595_s16 + $0x168] sm:$0xff]  ;;  %v4388_v54 = vld [vmem:[%s5595_s16 + $0x170] sm:$0xff] }
  0x51   : > { %357 = vst [vmem:[%s5600_s10 + $0xa0] sm:$0xff] %v4386_v52  ;;  %v4389_v55 = vld [vmem:[%s5595_s16 + $0x178] sm:$0xff]  ;;  %359 = vst [vmem:[%s5600_s10 + $0xa8] sm:$0xff] %v4387_v53  ;;  %v4390_v56 = vld [vmem:[%s5595_s16 + $0x1a0] sm:$0xff] }
  0x52   : > { %361 = vst [vmem:[%s5600_s10 + $0xb0] sm:$0xff] %v4388_v54  ;;  %363 = vst [vmem:[%s5600_s10 + $0xb8] sm:$0xff] %v4389_v55  ;;  %v4391_v57 = vld [vmem:[%s5595_s16 + $0x1a8] sm:$0xff]  ;;  %v4392_v58 = vld [vmem:[%s5595_s16 + $0x1b0] sm:$0xff] }
  0x53   : > { %365 = vst [vmem:[%s5600_s10 + $0xc0] sm:$0xff] %v4390_v56  ;;  %367 = vst [vmem:[%s5600_s10 + $0xc8] sm:$0xff] %v4391_v57  ;;  %v4393_v59 = vld [vmem:[%s5595_s16 + $0x1b8] sm:$0xff]  ;;  %v4394_v60 = vld [vmem:[%s5595_s16 + $0x1e0] sm:$0xff] }
  0x54   : > { %369 = vst [vmem:[%s5600_s10 + $0xd0] sm:$0xff] %v4392_v58  ;;  %v4395_v61 = vld [vmem:[%s5595_s16 + $0x1e8] sm:$0xff]  ;;  %371 = vst [vmem:[%s5600_s10 + $0xd8] sm:$0xff] %v4393_v59  ;;  %v4396_v62 = vld [vmem:[%s5595_s16 + $0x1f0] sm:$0xff] }
  0x55   : > { %373 = vst [vmem:[%s5600_s10 + $0xe0] sm:$0xff] %v4394_v60  ;;  %375 = vst [vmem:[%s5600_s10 + $0xe8] sm:$0xff] %v4395_v61  ;;  %v4397_v63 = vld [vmem:[%s5595_s16 + $0x1f8] sm:$0xff] }
  0x56   : > { %377 = vst [vmem:[%s5600_s10 + $0xf0] sm:$0xff] %v4396_v62  ;;  %379 = vst [vmem:[%s5600_s10 + $0xf8] sm:$0xff] %v4397_v63 }
  0x57 PF: > { %p4398_p0 = scmp.ge.s32.totalorder %s5410_s28, 1  ;;  %p412_p1 = scmp.lt.s32.totalorder %s5410_s28, 3 }
  0x59   : > { %p413_p2 = pnand %p4398_p0, %p412_p1 }
  0x5a   : > { %s482_s19 = sld [smem:[#allocation3 + %s5402_s26]] (!%p413_p2)  ;;  %v5413_v0 = vmov (!%p413_p2), 0   ;;  %s4407_s30 = sshll.u32 (!%p413_p2), %s5402_s26, 8 }
  0x5b   : > { %416 = sbr.rel (%p413_p2) target bundleno = 742 (0x2e6), region = 74  ;;  %5339 = vset.pattern.permute.xlu1 (!%p413_p2), %v5413_v0  ;;  %5338 = vset.pattern.permute.xlu0 (!%p413_p2), %v5413_v0  ;;  %s492_s20 = sld [smem:[#allocation3 + %s5402_s26]] (!%p413_p2)  ;;  %v5668_v1 = vstv (!%p413_p2), %s4407_s30 }
  0x5c   : > { %s426_s16 = sand.u32 (!%p413_p2), 1, %s5386_s23   ;;  %s419_s23 = sand.u32 (!%p413_p2), 1, %s5394_s25  }
  0x5d   : > { %s4400_s10 = sshll.u32 (!%p413_p2), %s426_s16, 8  ;;  %s4399_s25 = sshll.u32 (!%p413_p2), %s419_s23, 8 }
  0x5e   : > { %p504_p5 = scmp.lt.s32.totalorder (!%p413_p2), %s5402_s26, 1 }
  0x60   : > { %s4401_s21 = sshll.u32 (!%p413_p2), %s482_s19, 6  ;;  %s5838_s19 = scalar_lea.vmem (!%p413_p2), [#allocation5], %s4400_s10 }
  0x61   : > { %p484_p3 = scmp.lt.s32.totalorder (!%p413_p2), %s4401_s21, 127  ;;  %s4923_s22 = sshll.u32 (!%p413_p2), %s492_s20, 6 }
  0x62   : > { %s4924_s7 = sadd.s32 64, %s4923_s22  ;;  %s6331_s20 = scalar_lea.vmem [#allocation4], %s4399_s25 }
  0x63   : > { %s6705_s21 = smov (!%p484_p3, %s4401_s21), 127  ;;  %p495_p4 = scmp.lt.s32.totalorder %s4924_s7, 127 }
  0x64   : > { %s4402_s8 = sshll.u32 %s6705_s21, 3  ;;  %s6709_s26 = smov (!%p504_p5, %s5402_s26), 1 }
  0x65   : > { %s5673_s11 = scalar_lea.vmem %s6691_s3, %s4402_s8  ;;  %s6707_s7 = smov (!%p495_p4, %s4924_s7), 127 }
  0x66   : > { %v532_v2 = vld [vmem:[%s5673_s11 + $0x10] sm:$0xff]  ;;  %v530_v3 = vld [vmem:[%s5673_s11] sm:$0xff]  ;;  %v531_v4 = vld [vmem:[%s5673_s11 + $0x8] sm:$0xff]  ;;  %s4404_s12 = sshll.u32 %s6707_s7, 3  ;;  %s4925_s21 = sshll.u32 %s6709_s26, 8 }
  0x67   : > { %v597_v5 = vsub.s32 %v532_v2, %v5668_v1  ;;  %v595_v6 = vsub.s32 %v530_v3, %v5668_v1  ;;  %s5683_s15 = scalar_lea.vmem %s6692_s4, %s4404_s12  ;;  %v596_v7 = vsub.s32 %v531_v4, %v5668_v1  ;;  %s6629_s7 = scalar_lea.vmem %s6693_s5, %s4925_s21 }
  0x68   : > { %v1403_v8 = vld [vmem:[%s5683_s15 + $0x100] sm:$0xff]  ;;  %v1404_v10 = vld [vmem:[%s5683_s15 + $0x108] sm:$0xff]  ;;  %v1405_v14 = vld [vmem:[%s5683_s15 + $0x110] sm:$0xff] }
  0x69   : > { %666 = vperm.xlu1 %5339, %v597_v5   ;;  %660 = vperm.xlu0 %5338, %v595_v6   ;;  %v1371_v9 = vld [vmem:[%s5683_s15] sm:$0xff]  ;;  %v1467_v11 = vsub.s32 %v1403_v8, %v5668_v1  ;;  %v1468_v13 = vsub.s32 %v1404_v10, %v5668_v1  ;;  %v1372_v15 = vld [vmem:[%s5683_s15 + $0x8] sm:$0xff]  ;;  %v1469_v16 = vsub.s32 %v1405_v14, %v5668_v1  ;;  %v1373_v18 = vld [vmem:[%s5683_s15 + $0x10] sm:$0xff] }
  0x6a   : > { %v1435_v12 = vsub.s32 %v1371_v9, %v5668_v1  ;;  %v1436_v17 = vsub.s32 %v1372_v15, %v5668_v1  ;;  %v1406_v19 = vld [vmem:[%s5683_s15 + $0x118] sm:$0xff]  ;;  %v1437_v20 = vsub.s32 %v1373_v18, %v5668_v1  ;;  %v1407_v22 = vld [vmem:[%s5683_s15 + $0x120] sm:$0xff]  ;;  %v1408_v27 = vld [vmem:[%s5683_s15 + $0x128] sm:$0xff] }
  0x6b   : > { %v1470_v21 = vsub.s32 %v1406_v19, %v5668_v1  ;;  %v1374_v23 = vld [vmem:[%s5683_s15 + $0x18] sm:$0xff]  ;;  %v1471_v24 = vsub.s32 %v1407_v22, %v5668_v1  ;;  %v1375_v26 = vld [vmem:[%s5683_s15 + $0x20] sm:$0xff]  ;;  %v1472_v29 = vsub.s32 %v1408_v27, %v5668_v1  ;;  %v1409_v30 = vld [vmem:[%s5683_s15 + $0x130] sm:$0xff] }
  0x6c   : > { %v1438_v25 = vsub.s32 %v1374_v23, %v5668_v1  ;;  %v1439_v28 = vsub.s32 %v1375_v26, %v5668_v1  ;;  %v1376_v31 = vld [vmem:[%s5683_s15 + $0x28] sm:$0xff]  ;;  %v1473_v32 = vsub.s32 %v1409_v30, %v5668_v1  ;;  %v1377_v34 = vld [vmem:[%s5683_s15 + $0x30] sm:$0xff]  ;;  %v1410_v35 = vld [vmem:[%s5683_s15 + $0x138] sm:$0xff] }
  0x6d   : > { %1596 = vperm.xlu1 %5339, %v1467_v11   ;;  %663 = vperm.xlu0 %5338, %v596_v7   ;;  %v1440_v33 = vsub.s32 %v1376_v31, %v5668_v1  ;;  %v1441_v36 = vsub.s32 %v1377_v34, %v5668_v1  ;;  %v1474_v37 = vsub.s32 %v1410_v35, %v5668_v1  ;;  %v1411_v38 = vld [vmem:[%s5683_s15 + $0x140] sm:$0xff]  ;;  %v1378_v39 = vld [vmem:[%s5683_s15 + $0x38] sm:$0xff]  ;;  %v1412_v43 = vld [vmem:[%s5683_s15 + $0x148] sm:$0xff] }
  0x6e   : > { %v1475_v40 = vsub.s32 %v1411_v38, %v5668_v1  ;;  %v1442_v41 = vsub.s32 %v1378_v39, %v5668_v1  ;;  %v1379_v42 = vld [vmem:[%s5683_s15 + $0x40] sm:$0xff]  ;;  %v1476_v45 = vsub.s32 %v1412_v43, %v5668_v1  ;;  %v1413_v46 = vld [vmem:[%s5683_s15 + $0x150] sm:$0xff]  ;;  %v1380_v47 = vld [vmem:[%s5683_s15 + $0x48] sm:$0xff] }
  0x6f   : > { %v1443_v44 = vsub.s32 %v1379_v42, %v5668_v1  ;;  %v1477_v48 = vsub.s32 %v1413_v46, %v5668_v1  ;;  %v1444_v49 = vsub.s32 %v1380_v47, %v5668_v1  ;;  %v1381_v50 = vld [vmem:[%s5683_s15 + $0x50] sm:$0xff]  ;;  %v1414_v51 = vld [vmem:[%s5683_s15 + $0x158] sm:$0xff]  ;;  %v1415_v54 = vld [vmem:[%s5683_s15 + $0x160] sm:$0xff] }
  0x70   : > { %v1445_v52 = vsub.s32 %v1381_v50, %v5668_v1  ;;  %v1478_v53 = vsub.s32 %v1414_v51, %v5668_v1  ;;  %v1382_v55 = vld [vmem:[%s5683_s15 + $0x58] sm:$0xff]  ;;  %v1479_v56 = vsub.s32 %v1415_v54, %v5668_v1  ;;  %v1383_v58 = vld [vmem:[%s5683_s15 + $0x60] sm:$0xff]  ;;  %v1416_v59 = vld [vmem:[%s5683_s15 + $0x168] sm:$0xff] }
  0x71   : > { %1500 = vperm.xlu1 %5339, %v1435_v12   ;;  %1599 = vperm.xlu0 %5338, %v1468_v13   ;;  %v1446_v57 = vsub.s32 %v1382_v55, %v5668_v1  ;;  %v1447_v60 = vsub.s32 %v1383_v58, %v5668_v1  ;;  %v1480_v61 = vsub.s32 %v1416_v59, %v5668_v1  ;;  %v1417_v62 = vld [vmem:[%s5683_s15 + $0x170] sm:$0xff]  ;;  %v1384_v63 = vld [vmem:[%s5683_s15 + $0x68] sm:$0xff]  ;;  %v1418_v4 = vld [vmem:[%s5683_s15 + $0x178] sm:$0xff] }
  0x72   : > { %v1481_v0 = vsub.s32 %v1417_v62, %v5668_v1  ;;  %v1448_v2 = vsub.s32 %v1384_v63, %v5668_v1  ;;  %v1385_v3 = vld [vmem:[%s5683_s15 + $0x70] sm:$0xff]  ;;  %v1482_v6 = vsub.s32 %v1418_v4, %v5668_v1  ;;  %v1419_v7 = vld [vmem:[%s5683_s15 + $0x180] sm:$0xff]  ;;  %v1386_v8 = vld [vmem:[%s5683_s15 + $0x78] sm:$0xff] }
  0x73   : > { %v1449_v5 = vsub.s32 %v1385_v3, %v5668_v1  ;;  %v1483_v9 = vsub.s32 %v1419_v7, %v5668_v1  ;;  %v1450_v10 = vsub.s32 %v1386_v8, %v5668_v1  ;;  %v1387_v11 = vld [vmem:[%s5683_s15 + $0x80] sm:$0xff]  ;;  %v1420_v12 = vld [vmem:[%s5683_s15 + $0x188] sm:$0xff]  ;;  %v1421_v15 = vld [vmem:[%s5683_s15 + $0x190] sm:$0xff] }
  0x74   : > { %v1451_v13 = vsub.s32 %v1387_v11, %v5668_v1  ;;  %v1484_v14 = vsub.s32 %v1420_v12, %v5668_v1  ;;  %v1389_v19 = vld [vmem:[%s5683_s15 + $0x90] sm:$0xff]  ;;  %v1423_v23 = vld [vmem:[%s5683_s15 + $0x1a0] sm:$0xff]  ;;  %v533_v8 = vld [vmem:[%s5673_s11 + $0x18] sm:$0xff] }
  0x75   : > { %1602 = vperm.xlu1 %5339, %v1469_v16   ;;  %1503 = vperm.xlu0 %5338, %v1436_v17   ;;  %v1388_v16 = vld [vmem:[%s5683_s15 + $0x88] sm:$0xff]  ;;  %v1485_v17 = vsub.s32 %v1421_v15, %v5668_v1  ;;  %v1391_v27 = vld [vmem:[%s5683_s15 + $0xa0] sm:$0xff]  ;;  %v1425_v31 = vld [vmem:[%s5683_s15 + $0x1b0] sm:$0xff] }
  0x76   : > { %v1452_v18 = vsub.s32 %v1388_v16, %v5668_v1  ;;  %v1393_v35 = vld [vmem:[%s5683_s15 + $0xb0] sm:$0xff]  ;;  %v1427_v39 = vld [vmem:[%s5683_s15 + $0x1c0] sm:$0xff]  ;;  %v535_v15 = vld [vmem:[%s5673_s11 + $0x28] sm:$0xff] }
  0x77   : > { %v1395_v43 = vld [vmem:[%s5683_s15 + $0xc0] sm:$0xff]  ;;  %v1429_v47 = vld [vmem:[%s5683_s15 + $0x1d0] sm:$0xff] }
  0x78   : > { %v1397_v51 = vld [vmem:[%s5683_s15 + $0xd0] sm:$0xff]  ;;  %v1431_v55 = vld [vmem:[%s5683_s15 + $0x1e0] sm:$0xff] }
  0x79   : > { %1506 = vperm.xlu1 %5339, %v1437_v20   ;;  %1605 = vperm.xlu0 %5338, %v1470_v21   ;;  %v1422_v20 = vld [vmem:[%s5683_s15 + $0x198] sm:$0xff]  ;;  %v1453_v21 = vsub.s32 %v1389_v19, %v5668_v1  ;;  %v1399_v59 = vld [vmem:[%s5683_s15 + $0xe0] sm:$0xff]  ;;  %v1433_v63 = vld [vmem:[%s5683_s15 + $0x1f0] sm:$0xff] }
  0x7a   : > { %v1486_v22 = vsub.s32 %v1422_v20, %v5668_v1  ;;  %v1401_v4 = vld [vmem:[%s5683_s15 + $0xf0] sm:$0xff]  ;;  %v600_v20 = vsub.s32 %v535_v15, %v5668_v1 }
  0x7d   : > { %1608 = vperm.xlu1 %5339, %v1471_v24   ;;  %1509 = vperm.xlu0 %5338, %v1438_v25   ;;  %v1390_v24 = vld [vmem:[%s5683_s15 + $0x98] sm:$0xff]  ;;  %v1487_v25 = vsub.s32 %v1423_v23, %v5668_v1 }
  0x7e   : > { %v1454_v26 = vsub.s32 %v1390_v24, %v5668_v1  ;;  %v536_v24 = vld [vmem:[%s5673_s11 + $0x30] sm:$0xff] }
  0x81   : > { %1512 = vperm.xlu1 %5339, %v1439_v28   ;;  %1611 = vperm.xlu0 %5338, %v1472_v29   ;;  %v1424_v28 = vld [vmem:[%s5683_s15 + $0x1a8] sm:$0xff]  ;;  %v1455_v29 = vsub.s32 %v1391_v27, %v5668_v1 }
  0x82   : > { %v1488_v30 = vsub.s32 %v1424_v28, %v5668_v1  ;;  %v2750_v28 = vld [vmem:[%s5838_s19 + $0x18] sm:$0xff] }
  0x83   : > { %3468 = vmatprep.mubr.f32.mxu0 %v2750_v28  ;;  %v557_v28 = vld [vmem:[%s5673_s11 + $0xd8] sm:$0xff] }
  0x85   : > { %1614 = vperm.xlu1 %5339, %v1473_v32   ;;  %1515 = vperm.xlu0 %5338, %v1440_v33   ;;  %v1392_v32 = vld [vmem:[%s5683_s15 + $0xa8] sm:$0xff]  ;;  %v1489_v33 = vsub.s32 %v1425_v31, %v5668_v1  ;;  %v5414_v31 = vmov 1.0|1.0  }
  0x86   : > { %v1456_v34 = vsub.s32 %v1392_v32, %v5668_v1  ;;  %v538_v32 = vld [vmem:[%s5673_s11 + $0x40] sm:$0xff] }
  0x89   : > { %1518 = vperm.xlu1 %5339, %v1441_v36   ;;  %1617 = vperm.xlu0 %5338, %v1474_v37   ;;  %v1426_v36 = vld [vmem:[%s5683_s15 + $0x1b8] sm:$0xff]  ;;  %v1457_v37 = vsub.s32 %v1393_v35, %v5668_v1  ;;  %v2748_v35 = vld [vmem:[%s5838_s19 + $0x8] sm:$0xff] }
  0x8a   : > { %v1490_v38 = vsub.s32 %v1426_v36, %v5668_v1  ;;  %3355 = vmatprep.mubr.f32.mxu1 %v2748_v35  ;;  %v559_v35 = vld [vmem:[%s5673_s11 + $0xe8] sm:$0xff] }
  0x8d   : > { %1620 = vperm.xlu1 %5339, %v1475_v40   ;;  %1521 = vperm.xlu0 %5338, %v1442_v41   ;;  %v1394_v40 = vld [vmem:[%s5683_s15 + $0xb8] sm:$0xff]  ;;  %v1491_v41 = vsub.s32 %v1427_v39, %v5668_v1  ;;  %v540_v39 = vld [vmem:[%s5673_s11 + $0x50] sm:$0xff] }
  0x8e   : > { %v1458_v42 = vsub.s32 %v1394_v40, %v5668_v1 }
  0x91   : > { %1524 = vperm.xlu1 %5339, %v1443_v44   ;;  %1623 = vperm.xlu0 %5338, %v1476_v45   ;;  %v1428_v44 = vld [vmem:[%s5683_s15 + $0x1c8] sm:$0xff]  ;;  %v1459_v45 = vsub.s32 %v1395_v43, %v5668_v1  ;;  %v605_v43 = vsub.s32 %v540_v39, %v5668_v1  ;;  %v624_v39 = vsub.s32 %v559_v35, %v5668_v1 }
  0x92   : > { %v1492_v46 = vsub.s32 %v1428_v44, %v5668_v1  ;;  %v543_v44 = vld [vmem:[%s5673_s11 + $0x68] sm:$0xff] }
  0x95   : > { %1626 = vperm.xlu1 %5339, %v1477_v48   ;;  %1527 = vperm.xlu0 %5338, %v1444_v49   ;;  %v1396_v48 = vld [vmem:[%s5683_s15 + $0xc8] sm:$0xff]  ;;  %v1493_v49 = vsub.s32 %v1429_v47, %v5668_v1 }
  0x96   : > { %v1460_v50 = vsub.s32 %v1396_v48, %v5668_v1  ;;  %v608_v48 = vsub.s32 %v543_v44, %v5668_v1 }
  0x99   : > { %1530 = vperm.xlu1 %5339, %v1445_v52   ;;  %1629 = vperm.xlu0 %5338, %v1478_v53   ;;  %v1430_v52 = vld [vmem:[%s5683_s15 + $0x1d8] sm:$0xff]  ;;  %v1461_v53 = vsub.s32 %v1397_v51, %v5668_v1  ;;  %v544_v51 = vld [vmem:[%s5673_s11 + $0x70] sm:$0xff] }
  0x9a   : > { %v1494_v54 = vsub.s32 %v1430_v52, %v5668_v1 }
  0x9d   : > { %1632 = vperm.xlu1 %5339, %v1479_v56   ;;  %1533 = vperm.xlu0 %5338, %v1446_v57   ;;  %v1398_v56 = vld [vmem:[%s5683_s15 + $0xd8] sm:$0xff]  ;;  %v1495_v57 = vsub.s32 %v1431_v55, %v5668_v1  ;;  %v609_v55 = vsub.s32 %v544_v51, %v5668_v1 }
  0x9e   : > { %v1462_v58 = vsub.s32 %v1398_v56, %v5668_v1  ;;  %v547_v56 = vld [vmem:[%s5673_s11 + $0x88] sm:$0xff] }
  0xa1   : > { %1536 = vperm.xlu1 %5339, %v1447_v60   ;;  %1635 = vperm.xlu0 %5338, %v1480_v61   ;;  %v1432_v60 = vld [vmem:[%s5683_s15 + $0x1e8] sm:$0xff]  ;;  %v1463_v61 = vsub.s32 %v1399_v59, %v5668_v1 }
  0xa2   : > { %v1496_v62 = vsub.s32 %v1432_v60, %v5668_v1  ;;  %v612_v60 = vsub.s32 %v547_v56, %v5668_v1 }
  0xa5   : > { %1638 = vperm.xlu1 %5339, %v1481_v0   ;;  %1539 = vperm.xlu0 %5338, %v1448_v2   ;;  %v1400_v0 = vld [vmem:[%s5683_s15 + $0xe8] sm:$0xff]  ;;  %v1497_v2 = vsub.s32 %v1433_v63, %v5668_v1  ;;  %v548_v63 = vld [vmem:[%s5673_s11 + $0x90] sm:$0xff] }
  0xa6   : > { %v1464_v3 = vsub.s32 %v1400_v0, %v5668_v1 }
  0xa9   : > { %1542 = vperm.xlu1 %5339, %v1449_v5   ;;  %1641 = vperm.xlu0 %5338, %v1482_v6   ;;  %v1434_v5 = vld [vmem:[%s5683_s15 + $0x1f8] sm:$0xff]  ;;  %v1465_v6 = vsub.s32 %v1401_v4, %v5668_v1  ;;  %v613_v4 = vsub.s32 %v548_v63, %v5668_v1 }
  0xaa   : > { %v1498_v7 = vsub.s32 %v1434_v5, %v5668_v1  ;;  %v551_v5 = vld [vmem:[%s5673_s11 + $0xa8] sm:$0xff] }
  0xad   : > { %1644 = vperm.xlu1 %5339, %v1483_v9   ;;  %1545 = vperm.xlu0 %5338, %v1450_v10   ;;  %v516_v9 = vlaneseq  ;;  %v1402_v10 = vld [vmem:[%s5683_s15 + $0xf8] sm:$0xff] }
  0xaf   : > { %v5821_v16 = vand.u32 127, %v516_v9  ;;  %v616_v9 = vsub.s32 %v551_v5, %v5668_v1 }
  0xb1   : > { %1548 = vperm.xlu1 %5339, %v1451_v13   ;;  %1647 = vperm.xlu0 %5338, %v1484_v14   ;;  %v598_v13 = vsub.s32 %v533_v8, %v5668_v1  ;;  %v1466_v14 = vsub.s32 %v1402_v10, %v5668_v1  ;;  %v5831_v23 = vadd.s32 128, %v5821_v16 }
  0xb5   : > { %1650 = vperm.xlu1 %5339, %v1485_v17   ;;  %1551 = vperm.xlu0 %5338, %v1452_v18   ;;  %v534_v17 = vld [vmem:[%s5673_s11 + $0x20] sm:$0xff] }
  0xb9   : > { %1554 = vperm.xlu1 %5339, %v1453_v21   ;;  %1653 = vperm.xlu0 %5338, %v1486_v22   ;;  %v599_v21 = vsub.s32 %v534_v17, %v5668_v1  ;;  %v537_v22 = vld [vmem:[%s5673_s11 + $0x38] sm:$0xff] }
  0xba   : > { %v602_v27 = vsub.s32 %v537_v22, %v5668_v1  ;;  %v554_v22 = vld [vmem:[%s5673_s11 + $0xc0] sm:$0xff] }
  0xbd   : > { %1656 = vperm.xlu1 %5339, %v1487_v25   ;;  %1557 = vperm.xlu0 %5338, %v1454_v26  }
  0xc1   : > { %1560 = vperm.xlu1 %5339, %v1455_v29   ;;  %1659 = vperm.xlu0 %5338, %v1488_v30   ;;  %v601_v29 = vsub.s32 %v536_v24, %v5668_v1  ;;  %v539_v30 = vld [vmem:[%s5673_s11 + $0x48] sm:$0xff] }
  0xc2   : > { %v604_v36 = vsub.s32 %v539_v30, %v5668_v1 }
  0xc5   : > { %1662 = vperm.xlu1 %5339, %v1489_v33   ;;  %1563 = vperm.xlu0 %5338, %v1456_v34  }
  0xc9   : > { %1566 = vperm.xlu1 %5339, %v1457_v37   ;;  %1665 = vperm.xlu0 %5338, %v1490_v38   ;;  %v603_v37 = vsub.s32 %v538_v32, %v5668_v1  ;;  %v541_v38 = vld [vmem:[%s5673_s11 + $0x58] sm:$0xff] }
  0xcd   : > { %1668 = vperm.xlu1 %5339, %v1491_v41   ;;  %1569 = vperm.xlu0 %5338, %v1458_v42   ;;  %v606_v42 = vsub.s32 %v541_v38, %v5668_v1 }
  0xd1   : > { %1572 = vperm.xlu1 %5339, %v1459_v45   ;;  %1671 = vperm.xlu0 %5338, %v1492_v46   ;;  %v542_v45 = vld [vmem:[%s5673_s11 + $0x60] sm:$0xff] }
  0xd5   : > { %1674 = vperm.xlu1 %5339, %v1493_v49   ;;  %1575 = vperm.xlu0 %5338, %v1460_v50   ;;  %v607_v49 = vsub.s32 %v542_v45, %v5668_v1  ;;  %v545_v50 = vld [vmem:[%s5673_s11 + $0x78] sm:$0xff] }
  0xd9   : > { %1578 = vperm.xlu1 %5339, %v1461_v53   ;;  %1677 = vperm.xlu0 %5338, %v1494_v54   ;;  %v610_v54 = vsub.s32 %v545_v50, %v5668_v1 }
  0xdd   : > { %1680 = vperm.xlu1 %5339, %v1495_v57   ;;  %1581 = vperm.xlu0 %5338, %v1462_v58   ;;  %v546_v57 = vld [vmem:[%s5673_s11 + $0x80] sm:$0xff] }
  0xe1   : > { %1584 = vperm.xlu1 %5339, %v1463_v61   ;;  %1683 = vperm.xlu0 %5338, %v1496_v62   ;;  %v611_v61 = vsub.s32 %v546_v57, %v5668_v1  ;;  %v549_v62 = vld [vmem:[%s5673_s11 + $0x98] sm:$0xff] }
  0xe5   : > { %1686 = vperm.xlu1 %5339, %v1497_v2   ;;  %1587 = vperm.xlu0 %5338, %v1464_v3   ;;  %v614_v3 = vsub.s32 %v549_v62, %v5668_v1 }
  0xe8   : > { %v5814_v11 = vpop.permute.xlu1 %666  ;;  %v5816_v12 = vpop.permute.xlu0 %660 }
  0xe9   : > { %1590 = vperm.xlu1 %5339, %v1465_v6   ;;  %1689 = vperm.xlu0 %5338, %v1498_v7   ;;  %v550_v6 = vld [vmem:[%s5673_s11 + $0xa0] sm:$0xff] }
  0xea   : > { %v615_v10 = vsub.s32 %v550_v6, %v5668_v1 }
  0xec   : > { %v1597_v18 = vpop.permute.xlu1 %1596  ;;  %v5824_v19 = vpop.permute.xlu0 %663 }
  0xed   : > { %669 = vperm.xlu1 %5339, %v598_v13   ;;  %1593 = vperm.xlu0 %5338, %v1466_v14   ;;  %vm1820_vm0 = vcmp.eq.s32.totalorder %v1597_v18, %v5831_v23  ;;  %vm1819_vm4 = vcmp.eq.s32.totalorder %v1597_v18, %v5821_v16  ;;  %v553_v13 = vld [vmem:[%s5673_s11 + $0xb8] sm:$0xff]  ;;  %v552_v14 = vld [vmem:[%s5673_s11 + $0xb0] sm:$0xff] }
  0xee   : > { %v618_v18 = vsub.s32 %v553_v13, %v5668_v1 }
  0xf0   : > { %v1501_v25 = vpop.permute.xlu1 %1500  ;;  %v1600_v26 = vpop.permute.xlu0 %1599 }
  0xf1   : > { %675 = vperm.xlu1 %5339, %v600_v20   ;;  %vm1824_vm1 = vcmp.eq.s32.totalorder %v1600_v26, %v5831_v23  ;;  %vm1823_vm2 = vcmp.eq.s32.totalorder %v1600_v26, %v5821_v16  ;;  %672 = vperm.xlu0 %5338, %v599_v21   ;;  %vm1692_vm6 = vcmp.eq.s32.totalorder %v1501_v25, %v5831_v23  ;;  %v555_v21 = vld [vmem:[%s5673_s11 + $0xc8] sm:$0xff] }
  0xf2   : > { %vm4990_vm3 = vmpackc.low %vm1824_vm1, %vm1820_vm0  ;;  %vm1691_vm10 = vcmp.eq.s32.totalorder %v1501_v25, %v5821_v16  ;;  %v617_v20 = vsub.s32 %v552_v14, %v5668_v1  ;;  %v620_v26 = vsub.s32 %v555_v21, %v5668_v1 }
  0xf3   : > { %4991 = vmatprep.subr.msk.bf16.mxu0 %vm4990_vm3, %v5414_v31  ;;  %vm4992_vm5 = vmpackc.low %vm1823_vm2, %vm1819_vm4 }
  0xf4   : > { %v1603_v33 = vpop.permute.xlu1 %1602  ;;  %4993 = vmatpush1.bf16.msk.msra.mxu0 %vm4992_vm5, %v5414_v31  ;;  %v1504_v34 = vpop.permute.xlu0 %1503 }
  0xf5   : > { %681 = vperm.xlu1 %5339, %v602_v27   ;;  %vm1696_vm7 = vcmp.eq.s32.totalorder %v1504_v34, %v5831_v23  ;;  %vm1695_vm8 = vcmp.eq.s32.totalorder %v1504_v34, %v5821_v16  ;;  %678 = vperm.xlu0 %5338, %v601_v29   ;;  %vm1828_vm12 = vcmp.eq.s32.totalorder %v1603_v33, %v5831_v23  ;;  %v556_v29 = vld [vmem:[%s5673_s11 + $0xd0] sm:$0xff] }
  0xf6   : > { %vm4926_vm9 = vmpackc.low %vm1696_vm7, %vm1692_vm6  ;;  %vm1827_vm15 = vcmp.eq.s32.totalorder %v1603_v33, %v5821_v16  ;;  %v619_v27 = vsub.s32 %v554_v22, %v5668_v1  ;;  %v622_v33 = vsub.s32 %v557_v28, %v5668_v1  ;;  %v621_v34 = vsub.s32 %v556_v29, %v5668_v1 }
  0xf7   : > { %4927 = vmatprep.subr.msk.bf16.mxu1 %vm4926_vm9, %v5414_v31  ;;  %vm4928_vm11 = vmpackc.low %vm1695_vm8, %vm1691_vm10 }
  0xf8   : > { %v1507_v40 = vpop.permute.xlu1 %1506  ;;  %4929 = vmatpush1.bf16.msk.msra.mxu1 %vm4928_vm11, %v5414_v31  ;;  %v1606_v41 = vpop.permute.xlu0 %1605 }
  0xf9   : > { %vm1831_vm13 = vcmp.eq.s32.totalorder %v1606_v41, %v5821_v16  ;;  %vm1832_vm14 = vcmp.eq.s32.totalorder %v1606_v41, %v5831_v23  ;;  %687 = vperm.xlu1 %5339, %v604_v36   ;;  %684 = vperm.xlu0 %5338, %v603_v37   ;;  %vm1700_vm2 = vcmp.eq.s32.totalorder %v1507_v40, %v5831_v23  ;;  %v558_v36 = vld [vmem:[%s5673_s11 + $0xe0] sm:$0xff]  ;;  %v561_v41 = vld [vmem:[%s5673_s11 + $0xf8] sm:$0xff] }
  0xfa   : > { %vm4994_vm0 = vmpackc.low %vm1832_vm14, %vm1828_vm12  ;;  %vm1699_vm5 = vcmp.eq.s32.totalorder %v1507_v40, %v5821_v16  ;;  %v623_v40 = vsub.s32 %v558_v36, %v5668_v1  ;;  %v626_v45 = vsub.s32 %v561_v41, %v5668_v1 }
  0xfb   : > { %4995 = vmatprep.subr.msk.bf16.mxu0 %vm4994_vm0, %v5414_v31  ;;  %vm4996_vm1 = vmpackc.low %vm1831_vm13, %vm1827_vm15 }
  0xfc   : > { %v1609_v46 = vpop.permute.xlu1 %1608  ;;  %4997 = vmatpush1.bf16.msk.msra.mxu0 %vm4996_vm1, %v5414_v31  ;;  %v1510_v47 = vpop.permute.xlu0 %1509 }
  0xfd   : > { %vm1703_vm3 = vcmp.eq.s32.totalorder %v1510_v47, %v5821_v16  ;;  %vm1704_vm4 = vcmp.eq.s32.totalorder %v1510_v47, %v5831_v23  ;;  %693 = vperm.xlu1 %5339, %v606_v42   ;;  %690 = vperm.xlu0 %5338, %v605_v43   ;;  %vm1836_vm8 = vcmp.eq.s32.totalorder %v1609_v46, %v5831_v23  ;;  %v560_v42 = vld [vmem:[%s5673_s11 + $0xf0] sm:$0xff]  ;;  %v563_v47 = vld [vmem:[%s5673_s11 + $0x108] sm:$0xff] }
  0xfe   : > { %vm4930_vm6 = vmpackc.low %vm1704_vm4, %vm1700_vm2  ;;  %vm1835_vm11 = vcmp.eq.s32.totalorder %v1609_v46, %v5821_v16  ;;  %v625_v46 = vsub.s32 %v560_v42, %v5668_v1  ;;  %v628_v51 = vsub.s32 %v563_v47, %v5668_v1 }
  0xff   : > { %4931 = vmatprep.subr.msk.bf16.mxu1 %vm4930_vm6, %v5414_v31  ;;  %vm4932_vm7 = vmpackc.low %vm1703_vm3, %vm1699_vm5 }
 0x100   : > { %v1513_v52 = vpop.permute.xlu1 %1512  ;;  %4933 = vmatpush1.bf16.msk.msra.mxu1 %vm4932_vm7, %v5414_v31  ;;  %v1612_v53 = vpop.permute.xlu0 %1611 }
 0x101   : > { %vm1839_vm9 = vcmp.eq.s32.totalorder %v1612_v53, %v5821_v16  ;;  %vm1840_vm10 = vcmp.eq.s32.totalorder %v1612_v53, %v5831_v23  ;;  %699 = vperm.xlu1 %5339, %v608_v48   ;;  %696 = vperm.xlu0 %5338, %v607_v49   ;;  %vm1708_vm14 = vcmp.eq.s32.totalorder %v1513_v52, %v5831_v23  ;;  %v562_v48 = vld [vmem:[%s5673_s11 + $0x100] sm:$0xff]  ;;  %v565_v53 = vld [vmem:[%s5673_s11 + $0x118] sm:$0xff] }
 0x102   : > { %vm4998_vm12 = vmpackc.low %vm1840_vm10, %vm1836_vm8  ;;  %vm1707_vm1 = vcmp.eq.s32.totalorder %v1513_v52, %v5821_v16  ;;  %v627_v52 = vsub.s32 %v562_v48, %v5668_v1  ;;  %v630_v57 = vsub.s32 %v565_v53, %v5668_v1 }
 0x103   : > { %4999 = vmatprep.subr.msk.bf16.mxu0 %vm4998_vm12, %v5414_v31  ;;  %vm5000_vm13 = vmpackc.low %vm1839_vm9, %vm1835_vm11 }
 0x104   : > { %v1615_v58 = vpop.permute.xlu1 %1614  ;;  %5001 = vmatpush1.bf16.msk.msra.mxu0 %vm5000_vm13, %v5414_v31  ;;  %v1516_v59 = vpop.permute.xlu0 %1515 }
 0x105   : > { %vm1711_vm15 = vcmp.eq.s32.totalorder %v1516_v59, %v5821_v16  ;;  %vm1712_vm0 = vcmp.eq.s32.totalorder %v1516_v59, %v5831_v23  ;;  %705 = vperm.xlu1 %5339, %v610_v54   ;;  %702 = vperm.xlu0 %5338, %v609_v55   ;;  %vm1844_vm4 = vcmp.eq.s32.totalorder %v1615_v58, %v5831_v23  ;;  %v564_v54 = vld [vmem:[%s5673_s11 + $0x110] sm:$0xff]  ;;  %v567_v59 = vld [vmem:[%s5673_s11 + $0x128] sm:$0xff] }
 0x106   : > { %vm4934_vm2 = vmpackc.low %vm1712_vm0, %vm1708_vm14  ;;  %vm1843_vm7 = vcmp.eq.s32.totalorder %v1615_v58, %v5821_v16  ;;  %v629_v58 = vsub.s32 %v564_v54, %v5668_v1  ;;  %v632_v63 = vsub.s32 %v567_v59, %v5668_v1 }
 0x107   : > { %4935 = vmatprep.subr.msk.bf16.mxu1 %vm4934_vm2, %v5414_v31  ;;  %vm4936_vm3 = vmpackc.low %vm1711_vm15, %vm1707_vm1 }
 0x108   : > { %v1519_v0 = vpop.permute.xlu1 %1518  ;;  %4937 = vmatpush1.bf16.msk.msra.mxu1 %vm4936_vm3, %v5414_v31  ;;  %v1618_v2 = vpop.permute.xlu0 %1617 }
 0x109   : > { %vm1847_vm5 = vcmp.eq.s32.totalorder %v1618_v2, %v5821_v16  ;;  %vm1848_vm6 = vcmp.eq.s32.totalorder %v1618_v2, %v5831_v23  ;;  %711 = vperm.xlu1 %5339, %v612_v60   ;;  %708 = vperm.xlu0 %5338, %v611_v61   ;;  %vm1716_vm10 = vcmp.eq.s32.totalorder %v1519_v0, %v5831_v23  ;;  %v566_v60 = vld [vmem:[%s5673_s11 + $0x120] sm:$0xff]  ;;  %v569_v2 = vld [vmem:[%s5673_s11 + $0x138] sm:$0xff] }
 0x10a   : > { %vm5002_vm8 = vmpackc.low %vm1848_vm6, %vm1844_vm4  ;;  %vm1715_vm13 = vcmp.eq.s32.totalorder %v1519_v0, %v5821_v16  ;;  %v631_v0 = vsub.s32 %v566_v60, %v5668_v1  ;;  %v634_v6 = vsub.s32 %v569_v2, %v5668_v1 }
 0x10b   : > { %5003 = vmatprep.subr.msk.bf16.mxu0 %vm5002_vm8, %v5414_v31  ;;  %vm5004_vm9 = vmpackc.low %vm1847_vm5, %vm1843_vm7 }
 0x10c   : > { %v1621_v7 = vpop.permute.xlu1 %1620  ;;  %5005 = vmatpush1.bf16.msk.msra.mxu0 %vm5004_vm9, %v5414_v31  ;;  %v1522_v8 = vpop.permute.xlu0 %1521 }
 0x10d   : > { %vm1719_vm11 = vcmp.eq.s32.totalorder %v1522_v8, %v5821_v16  ;;  %vm1720_vm12 = vcmp.eq.s32.totalorder %v1522_v8, %v5831_v23  ;;  %717 = vperm.xlu1 %5339, %v614_v3   ;;  %714 = vperm.xlu0 %5338, %v613_v4   ;;  %vm1852_vm0 = vcmp.eq.s32.totalorder %v1621_v7, %v5831_v23  ;;  %v568_v3 = vld [vmem:[%s5673_s11 + $0x130] sm:$0xff]  ;;  %v571_v8 = vld [vmem:[%s5673_s11 + $0x148] sm:$0xff] }
 0x10e   : > { %vm4938_vm14 = vmpackc.low %vm1720_vm12, %vm1716_vm10  ;;  %vm1851_vm3 = vcmp.eq.s32.totalorder %v1621_v7, %v5821_v16  ;;  %v633_v7 = vsub.s32 %v568_v3, %v5668_v1  ;;  %v636_v14 = vsub.s32 %v571_v8, %v5668_v1 }
 0x10f   : > { %4939 = vmatprep.subr.msk.bf16.mxu1 %vm4938_vm14, %v5414_v31  ;;  %vm4940_vm15 = vmpackc.low %vm1719_vm11, %vm1715_vm13 }
 0x110   : > { %v1525_v15 = vpop.permute.xlu1 %1524  ;;  %4941 = vmatpush1.bf16.msk.msra.mxu1 %vm4940_vm15, %v5414_v31  ;;  %v1624_v17 = vpop.permute.xlu0 %1623 }
 0x111   : > { %vm1855_vm1 = vcmp.eq.s32.totalorder %v1624_v17, %v5821_v16  ;;  %vm1856_vm2 = vcmp.eq.s32.totalorder %v1624_v17, %v5831_v23  ;;  %723 = vperm.xlu1 %5339, %v616_v9   ;;  %720 = vperm.xlu0 %5338, %v615_v10   ;;  %vm1724_vm6 = vcmp.eq.s32.totalorder %v1525_v15, %v5831_v23  ;;  %v570_v9 = vld [vmem:[%s5673_s11 + $0x140] sm:$0xff]  ;;  %v573_v17 = vld [vmem:[%s5673_s11 + $0x158] sm:$0xff] }
 0x112   : > { %vm5006_vm4 = vmpackc.low %vm1856_vm2, %vm1852_vm0  ;;  %vm1723_vm9 = vcmp.eq.s32.totalorder %v1525_v15, %v5821_v16  ;;  %v635_v15 = vsub.s32 %v570_v9, %v5668_v1  ;;  %v638_v22 = vsub.s32 %v573_v17, %v5668_v1 }
 0x113   : > { %5007 = vmatprep.subr.msk.bf16.mxu0 %vm5006_vm4, %v5414_v31  ;;  %vm5008_vm5 = vmpackc.low %vm1855_vm1, %vm1851_vm3 }
 0x114   : > { %v1627_v24 = vpop.permute.xlu1 %1626  ;;  %5009 = vmatpush1.bf16.msk.msra.mxu0 %vm5008_vm5, %v5414_v31  ;;  %v1528_v25 = vpop.permute.xlu0 %1527 }
 0x115   : > { %vm1727_vm7 = vcmp.eq.s32.totalorder %v1528_v25, %v5821_v16  ;;  %vm1728_vm8 = vcmp.eq.s32.totalorder %v1528_v25, %v5831_v23  ;;  %729 = vperm.xlu1 %5339, %v618_v18   ;;  %726 = vperm.xlu0 %5338, %v617_v20   ;;  %vm1860_vm12 = vcmp.eq.s32.totalorder %v1627_v24, %v5831_v23  ;;  %v572_v18 = vld [vmem:[%s5673_s11 + $0x150] sm:$0xff]  ;;  %v575_v25 = vld [vmem:[%s5673_s11 + $0x168] sm:$0xff] }
 0x116   : > { %vm4942_vm10 = vmpackc.low %vm1728_vm8, %vm1724_vm6  ;;  %vm1859_vm15 = vcmp.eq.s32.totalorder %v1627_v24, %v5821_v16  ;;  %v637_v24 = vsub.s32 %v572_v18, %v5668_v1  ;;  %v640_v29 = vsub.s32 %v575_v25, %v5668_v1 }
 0x117   : > { %4943 = vmatprep.subr.msk.bf16.mxu1 %vm4942_vm10, %v5414_v31  ;;  %vm4944_vm11 = vmpackc.low %vm1727_vm7, %vm1723_vm9 }
 0x118   : > { %v1531_v30 = vpop.permute.xlu1 %1530  ;;  %4945 = vmatpush1.bf16.msk.msra.mxu1 %vm4944_vm11, %v5414_v31  ;;  %v1630_v32 = vpop.permute.xlu0 %1629 }
 0x119   : > { %vm1863_vm13 = vcmp.eq.s32.totalorder %v1630_v32, %v5821_v16  ;;  %vm1864_vm14 = vcmp.eq.s32.totalorder %v1630_v32, %v5831_v23  ;;  %735 = vperm.xlu1 %5339, %v620_v26   ;;  %732 = vperm.xlu0 %5338, %v619_v27   ;;  %vm1732_vm2 = vcmp.eq.s32.totalorder %v1531_v30, %v5831_v23  ;;  %v574_v26 = vld [vmem:[%s5673_s11 + $0x160] sm:$0xff]  ;;  %v577_v32 = vld [vmem:[%s5673_s11 + $0x178] sm:$0xff] }
 0x11a   : > { %vm5010_vm0 = vmpackc.low %vm1864_vm14, %vm1860_vm12  ;;  %vm1731_vm5 = vcmp.eq.s32.totalorder %v1531_v30, %v5821_v16  ;;  %v639_v30 = vsub.s32 %v574_v26, %v5668_v1  ;;  %v642_v36 = vsub.s32 %v577_v32, %v5668_v1 }
 0x11b   : > { %5011 = vmatprep.subr.msk.bf16.mxu0 %vm5010_vm0, %v5414_v31  ;;  %vm5012_vm1 = vmpackc.low %vm1863_vm13, %vm1859_vm15 }
 0x11c   : > { %v1633_v37 = vpop.permute.xlu1 %1632  ;;  %5013 = vmatpush1.bf16.msk.msra.mxu0 %vm5012_vm1, %v5414_v31  ;;  %v1534_v38 = vpop.permute.xlu0 %1533 }
 0x11d   : > { %vm1735_vm3 = vcmp.eq.s32.totalorder %v1534_v38, %v5821_v16  ;;  %vm1736_vm4 = vcmp.eq.s32.totalorder %v1534_v38, %v5831_v23  ;;  %741 = vperm.xlu1 %5339, %v622_v33   ;;  %738 = vperm.xlu0 %5338, %v621_v34   ;;  %vm1868_vm8 = vcmp.eq.s32.totalorder %v1633_v37, %v5831_v23  ;;  %v576_v33 = vld [vmem:[%s5673_s11 + $0x170] sm:$0xff]  ;;  %v579_v38 = vld [vmem:[%s5673_s11 + $0x188] sm:$0xff] }
 0x11e   : > { %vm4946_vm6 = vmpackc.low %vm1736_vm4, %vm1732_vm2  ;;  %vm1867_vm11 = vcmp.eq.s32.totalorder %v1633_v37, %v5821_v16  ;;  %v641_v37 = vsub.s32 %v576_v33, %v5668_v1  ;;  %v644_v42 = vsub.s32 %v579_v38, %v5668_v1  ;;  %v5415_v38 = vmov 0.0  }
 0x11f   : > { %4947 = vmatprep.subr.msk.bf16.mxu1 %vm4946_vm6, %v5414_v31  ;;  %vm4948_vm7 = vmpackc.low %vm1735_vm3, %vm1731_vm5 }
 0x120   : > { %v1537_v43 = vpop.permute.xlu1 %1536  ;;  %4949 = vmatpush1.bf16.msk.msra.mxu1 %vm4948_vm7, %v5414_v31  ;;  %v1636_v44 = vpop.permute.xlu0 %1635 }
 0x121   : > { %vm1871_vm9 = vcmp.eq.s32.totalorder %v1636_v44, %v5821_v16  ;;  %vm1872_vm10 = vcmp.eq.s32.totalorder %v1636_v44, %v5831_v23  ;;  %747 = vperm.xlu1 %5339, %v624_v39   ;;  %744 = vperm.xlu0 %5338, %v623_v40   ;;  %vm1740_vm14 = vcmp.eq.s32.totalorder %v1537_v43, %v5831_v23  ;;  %v578_v39 = vld [vmem:[%s5673_s11 + $0x180] sm:$0xff]  ;;  %v581_v44 = vld [vmem:[%s5673_s11 + $0x198] sm:$0xff] }
 0x122   : > { %vm5014_vm12 = vmpackc.low %vm1872_vm10, %vm1868_vm8  ;;  %vm1739_vm1 = vcmp.eq.s32.totalorder %v1537_v43, %v5821_v16  ;;  %v643_v43 = vsub.s32 %v578_v39, %v5668_v1  ;;  %v646_v48 = vsub.s32 %v581_v44, %v5668_v1 }
 0x123   : > { %5015 = vmatprep.subr.msk.bf16.mxu0 %vm5014_vm12, %v5414_v31  ;;  %vm5016_vm13 = vmpackc.low %vm1871_vm9, %vm1867_vm11 }
 0x124   : > { %v1639_v49 = vpop.permute.xlu1 %1638  ;;  %5017 = vmatpush1.bf16.msk.msra.mxu0 %vm5016_vm13, %v5414_v31  ;;  %v1540_v50 = vpop.permute.xlu0 %1539 }
 0x125   : > { %vm1743_vm15 = vcmp.eq.s32.totalorder %v1540_v50, %v5821_v16  ;;  %vm1744_vm0 = vcmp.eq.s32.totalorder %v1540_v50, %v5831_v23  ;;  %753 = vperm.xlu1 %5339, %v626_v45   ;;  %750 = vperm.xlu0 %5338, %v625_v46   ;;  %vm1876_vm4 = vcmp.eq.s32.totalorder %v1639_v49, %v5831_v23  ;;  %v580_v45 = vld [vmem:[%s5673_s11 + $0x190] sm:$0xff]  ;;  %v583_v50 = vld [vmem:[%s5673_s11 + $0x1a8] sm:$0xff] }
 0x126   : > { %vm4950_vm2 = vmpackc.low %vm1744_vm0, %vm1740_vm14  ;;  %vm1875_vm7 = vcmp.eq.s32.totalorder %v1639_v49, %v5821_v16  ;;  %v645_v49 = vsub.s32 %v580_v45, %v5668_v1  ;;  %v648_v54 = vsub.s32 %v583_v50, %v5668_v1  ;;  %v6212_v45 = vld [vmem:[%s5838_s19 + $0x50] sm:$0xff] }
 0x127   : > { %vm4952_vm3 = vmpackc.low %vm1743_vm15, %vm1739_vm1  ;;  %4951 = vmatprep.subr.msk.bf16.mxu1 %vm4950_vm2, %v5414_v31 }
 0x128   : > { %v1543_v55 = vpop.permute.xlu1 %1542  ;;  %4953 = vmatpush1.bf16.msk.msra.mxu1 %vm4952_vm3, %v5414_v31  ;;  %v1642_v56 = vpop.permute.xlu0 %1641 }
 0x129   : > { %vm1879_vm5 = vcmp.eq.s32.totalorder %v1642_v56, %v5821_v16  ;;  %vm1880_vm6 = vcmp.eq.s32.totalorder %v1642_v56, %v5831_v23  ;;  %759 = vperm.xlu1 %5339, %v628_v51   ;;  %756 = vperm.xlu0 %5338, %v627_v52   ;;  %vm1748_vm10 = vcmp.eq.s32.totalorder %v1543_v55, %v5831_v23  ;;  %v582_v51 = vld [vmem:[%s5673_s11 + $0x1a0] sm:$0xff]  ;;  %v585_v56 = vld [vmem:[%s5673_s11 + $0x1b8] sm:$0xff] }
 0x12a   : > { %vm5018_vm8 = vmpackc.low %vm1880_vm6, %vm1876_vm4  ;;  %vm1747_vm13 = vcmp.eq.s32.totalorder %v1543_v55, %v5821_v16  ;;  %v647_v55 = vsub.s32 %v582_v51, %v5668_v1  ;;  %v650_v60 = vsub.s32 %v585_v56, %v5668_v1  ;;  %v6234_v51 = vld [vmem:[%s5838_s19 + $0x70] sm:$0xff] }
 0x12b   : > { %vm5020_vm9 = vmpackc.low %vm1879_vm5, %vm1875_vm7  ;;  %5019 = vmatprep.subr.msk.bf16.mxu0 %vm5018_vm8, %v5414_v31 }
 0x12c   : > { %v1645_v61 = vpop.permute.xlu1 %1644  ;;  %5021 = vmatpush1.bf16.msk.msra.mxu0 %vm5020_vm9, %v5414_v31  ;;  %v1546_v62 = vpop.permute.xlu0 %1545 }
 0x12d   : > { %vm1751_vm11 = vcmp.eq.s32.totalorder %v1546_v62, %v5821_v16  ;;  %vm1752_vm12 = vcmp.eq.s32.totalorder %v1546_v62, %v5831_v23  ;;  %765 = vperm.xlu1 %5339, %v630_v57   ;;  %762 = vperm.xlu0 %5338, %v629_v58   ;;  %vm1884_vm0 = vcmp.eq.s32.totalorder %v1645_v61, %v5831_v23  ;;  %v584_v57 = vld [vmem:[%s5673_s11 + $0x1b0] sm:$0xff]  ;;  %v587_v62 = vld [vmem:[%s5673_s11 + $0x1c8] sm:$0xff] }
 0x12e   : > { %vm4954_vm14 = vmpackc.low %vm1752_vm12, %vm1748_vm10  ;;  %vm1883_vm3 = vcmp.eq.s32.totalorder %v1645_v61, %v5821_v16  ;;  %v649_v61 = vsub.s32 %v584_v57, %v5668_v1  ;;  %v652_v3 = vsub.s32 %v587_v62, %v5668_v1  ;;  %v6256_v57 = vld [vmem:[%s5838_s19 + $0x90] sm:$0xff] }
 0x12f   : > { %vm4956_vm15 = vmpackc.low %vm1751_vm11, %vm1747_vm13  ;;  %4955 = vmatprep.subr.msk.bf16.mxu1 %vm4954_vm14, %v5414_v31 }
 0x130   : > { %v1549_v4 = vpop.permute.xlu1 %1548  ;;  %4957 = vmatpush1.bf16.msk.msra.mxu1 %vm4956_vm15, %v5414_v31  ;;  %v1648_v5 = vpop.permute.xlu0 %1647 }
 0x131   : > { %vm1887_vm1 = vcmp.eq.s32.totalorder %v1648_v5, %v5821_v16  ;;  %vm1888_vm2 = vcmp.eq.s32.totalorder %v1648_v5, %v5831_v23  ;;  %771 = vperm.xlu1 %5339, %v632_v63   ;;  %768 = vperm.xlu0 %5338, %v631_v0   ;;  %vm1756_vm6 = vcmp.eq.s32.totalorder %v1549_v4, %v5831_v23  ;;  %v586_v63 = vld [vmem:[%s5673_s11 + $0x1c0] sm:$0xff]  ;;  %v589_v5 = vld [vmem:[%s5673_s11 + $0x1d8] sm:$0xff] }
 0x132   : > { %vm5022_vm4 = vmpackc.low %vm1888_vm2, %vm1884_vm0  ;;  %vm1755_vm9 = vcmp.eq.s32.totalorder %v1549_v4, %v5821_v16  ;;  %v651_v4 = vsub.s32 %v586_v63, %v5668_v1  ;;  %v654_v9 = vsub.s32 %v589_v5, %v5668_v1  ;;  %v6278_v63 = vld [vmem:[%s5838_s19 + $0xb0] sm:$0xff] }
 0x133   : > { %vm5024_vm5 = vmpackc.low %vm1887_vm1, %vm1883_vm3  ;;  %5023 = vmatprep.subr.msk.bf16.mxu0 %vm5022_vm4, %v5414_v31 }
 0x134   : > { %v1651_v10 = vpop.permute.xlu1 %1650  ;;  %5025 = vmatpush1.bf16.msk.msra.mxu0 %vm5024_vm5, %v5414_v31  ;;  %v1552_v13 = vpop.permute.xlu0 %1551 }
 0x135   : > { %vm1759_vm7 = vcmp.eq.s32.totalorder %v1552_v13, %v5821_v16  ;;  %vm1760_vm8 = vcmp.eq.s32.totalorder %v1552_v13, %v5831_v23  ;;  %777 = vperm.xlu1 %5339, %v634_v6   ;;  %774 = vperm.xlu0 %5338, %v633_v7   ;;  %vm1892_vm12 = vcmp.eq.s32.totalorder %v1651_v10, %v5831_v23  ;;  %v588_v6 = vld [vmem:[%s5673_s11 + $0x1d0] sm:$0xff]  ;;  %v591_v13 = vld [vmem:[%s5673_s11 + $0x1e8] sm:$0xff] }
 0x136   : > { %vm4958_vm10 = vmpackc.low %vm1760_vm8, %vm1756_vm6  ;;  %vm1891_vm15 = vcmp.eq.s32.totalorder %v1651_v10, %v5821_v16  ;;  %v653_v10 = vsub.s32 %v588_v6, %v5668_v1  ;;  %v656_v18 = vsub.s32 %v591_v13, %v5668_v1  ;;  %v6303_v6 = vld [vmem:[%s5838_s19 + $0xd0] sm:$0xff] }
 0x137   : > { %vm4960_vm11 = vmpackc.low %vm1759_vm7, %vm1755_vm9  ;;  %4959 = vmatprep.subr.msk.bf16.mxu1 %vm4958_vm10, %v5414_v31 }
 0x138   : > { %v1555_v20 = vpop.permute.xlu1 %1554  ;;  %4961 = vmatpush1.bf16.msk.msra.mxu1 %vm4960_vm11, %v5414_v31  ;;  %v1654_v21 = vpop.permute.xlu0 %1653 }
 0x139   : > { %vm1895_vm13 = vcmp.eq.s32.totalorder %v1654_v21, %v5821_v16  ;;  %vm1896_vm14 = vcmp.eq.s32.totalorder %v1654_v21, %v5831_v23  ;;  %783 = vperm.xlu1 %5339, %v636_v14   ;;  %780 = vperm.xlu0 %5338, %v635_v15   ;;  %vm1764_vm2 = vcmp.eq.s32.totalorder %v1555_v20, %v5831_v23  ;;  %v590_v14 = vld [vmem:[%s5673_s11 + $0x1e0] sm:$0xff]  ;;  %v593_v21 = vld [vmem:[%s5673_s11 + $0x1f8] sm:$0xff] }
 0x13a   : > { %vm5026_vm0 = vmpackc.low %vm1896_vm14, %vm1892_vm12  ;;  %vm1763_vm5 = vcmp.eq.s32.totalorder %v1555_v20, %v5821_v16  ;;  %v655_v20 = vsub.s32 %v590_v14, %v5668_v1  ;;  %v658_v26 = vsub.s32 %v593_v21, %v5668_v1  ;;  %v6325_v14 = vld [vmem:[%s5838_s19 + $0xf0] sm:$0xff] }
 0x13b   : > { %vm5028_vm1 = vmpackc.low %vm1895_vm13, %vm1891_vm15  ;;  %5027 = vmatprep.subr.msk.bf16.mxu0 %vm5026_vm0, %v5414_v31 }
 0x13c   : > { %v1657_v27 = vpop.permute.xlu1 %1656  ;;  %5029 = vmatpush1.bf16.msk.msra.mxu0 %vm5028_vm1, %v5414_v31  ;;  %v1558_v28 = vpop.permute.xlu0 %1557 }
 0x13d   : > { %vm1767_vm3 = vcmp.eq.s32.totalorder %v1558_v28, %v5821_v16  ;;  %vm1768_vm4 = vcmp.eq.s32.totalorder %v1558_v28, %v5831_v23  ;;  %789 = vperm.xlu1 %5339, %v638_v22   ;;  %786 = vperm.xlu0 %5338, %v637_v24   ;;  %vm1900_vm8 = vcmp.eq.s32.totalorder %v1657_v27, %v5831_v23  ;;  %v592_v22 = vld [vmem:[%s5673_s11 + $0x1f0] sm:$0xff] }
 0x13e   : > { %vm4962_vm6 = vmpackc.low %vm1768_vm4, %vm1764_vm2  ;;  %vm1899_vm11 = vcmp.eq.s32.totalorder %v1657_v27, %v5821_v16  ;;  %v657_v27 = vsub.s32 %v592_v22, %v5668_v1  ;;  %v5340_v22 = vld [vmem:[%s5838_s19 + $0x8] sm:$0xff] }
 0x13f   : > { %vm4964_vm7 = vmpackc.low %vm1767_vm3, %vm1763_vm5  ;;  %4963 = vmatprep.subr.msk.bf16.mxu1 %vm4962_vm6, %v5414_v31 }
 0x140   : > { %v1561_v34 = vpop.permute.xlu1 %1560  ;;  %4965 = vmatpush1.bf16.msk.msra.mxu1 %vm4964_vm7, %v5414_v31  ;;  %v1660_v35 = vpop.permute.xlu0 %1659 }
 0x141   : > { %vm1903_vm9 = vcmp.eq.s32.totalorder %v1660_v35, %v5821_v16  ;;  %vm1904_vm10 = vcmp.eq.s32.totalorder %v1660_v35, %v5831_v23  ;;  %795 = vperm.xlu1 %5339, %v640_v29   ;;  %792 = vperm.xlu0 %5338, %v639_v30   ;;  %vm1772_vm14 = vcmp.eq.s32.totalorder %v1561_v34, %v5831_v23 }
 0x142   : > { %vm5030_vm12 = vmpackc.low %vm1904_vm10, %vm1900_vm8  ;;  %vm1771_vm1 = vcmp.eq.s32.totalorder %v1561_v34, %v5821_v16  ;;  %v6151_v34 = vld [vmem:[%s5838_s19 + $0x10] sm:$0xff] }
 0x143   : > { %vm5032_vm13 = vmpackc.low %vm1903_vm9, %vm1899_vm11  ;;  %5031 = vmatprep.subr.msk.bf16.mxu0 %vm5030_vm12, %v5414_v31 }
 0x144   : > { %v1663_v40 = vpop.permute.xlu1 %1662  ;;  %5033 = vmatpush1.bf16.msk.msra.mxu0 %vm5032_vm13, %v5414_v31  ;;  %v1564_v41 = vpop.permute.xlu0 %1563 }
 0x145   : > { %vm1775_vm15 = vcmp.eq.s32.totalorder %v1564_v41, %v5821_v16  ;;  %vm1776_vm0 = vcmp.eq.s32.totalorder %v1564_v41, %v5831_v23  ;;  %801 = vperm.xlu1 %5339, %v642_v36   ;;  %798 = vperm.xlu0 %5338, %v641_v37   ;;  %vm1908_vm4 = vcmp.eq.s32.totalorder %v1663_v40, %v5831_v23  ;;  %v6168_v36 = vld [vmem:[%s5838_s19 + $0x30] sm:$0xff]  ;;  %v6175_v37 = vld [vmem:[%s5838_s19] sm:$0xff]  ;;  %v6194_v41 = vld [vmem:[%s5838_s19 + $0x58] sm:$0xff] }
 0x146   : > { %vm4966_vm2 = vmpackc.low %vm1776_vm0, %vm1772_vm14  ;;  %vm1907_vm7 = vcmp.eq.s32.totalorder %v1663_v40, %v5821_v16  ;;  %v6184_v40 = vld [vmem:[%s5838_s19 + $0x28] sm:$0xff] }
 0x147   : > { %vm4968_vm3 = vmpackc.low %vm1775_vm15, %vm1771_vm1  ;;  %4967 = vmatprep.subr.msk.bf16.mxu1 %vm4966_vm2, %v5414_v31 }
 0x148   : > { %v1567_v46 = vpop.permute.xlu1 %1566  ;;  %4969 = vmatpush1.bf16.msk.msra.mxu1 %vm4968_vm3, %v5414_v31  ;;  %v1666_v47 = vpop.permute.xlu0 %1665 }
 0x149   : > { %vm1911_vm5 = vcmp.eq.s32.totalorder %v1666_v47, %v5821_v16  ;;  %vm1912_vm6 = vcmp.eq.s32.totalorder %v1666_v47, %v5831_v23  ;;  %807 = vperm.xlu1 %5339, %v644_v42   ;;  %804 = vperm.xlu0 %5338, %v643_v43   ;;  %vm1780_vm10 = vcmp.eq.s32.totalorder %v1567_v46, %v5831_v23  ;;  %v6201_v42 = vld [vmem:[%s5838_s19 + $0x20] sm:$0xff]  ;;  %v6205_v43 = vld [vmem:[%s5838_s19 + $0x48] sm:$0xff]  ;;  %v6219_v47 = vld [vmem:[%s5838_s19 + $0x78] sm:$0xff] }
 0x14a   : > { %vm5034_vm8 = vmpackc.low %vm1912_vm6, %vm1908_vm4  ;;  %vm1779_vm13 = vcmp.eq.s32.totalorder %v1567_v46, %v5821_v16 }
 0x14b   : > { %vm5036_vm9 = vmpackc.low %vm1911_vm5, %vm1907_vm7  ;;  %5035 = vmatprep.subr.msk.bf16.mxu0 %vm5034_vm8, %v5414_v31 }
 0x14c   : > { %v1669_v52 = vpop.permute.xlu1 %1668  ;;  %5037 = vmatpush1.bf16.msk.msra.mxu0 %vm5036_vm9, %v5414_v31  ;;  %v1570_v53 = vpop.permute.xlu0 %1569 }
 0x14d   : > { %vm1783_vm11 = vcmp.eq.s32.totalorder %v1570_v53, %v5821_v16  ;;  %vm1784_vm12 = vcmp.eq.s32.totalorder %v1570_v53, %v5831_v23  ;;  %813 = vperm.xlu1 %5339, %v646_v48   ;;  %810 = vperm.xlu0 %5338, %v645_v49   ;;  %vm1916_vm0 = vcmp.eq.s32.totalorder %v1669_v52, %v5831_v23  ;;  %v6226_v48 = vld [vmem:[%s5838_s19 + $0x40] sm:$0xff]  ;;  %v6229_v49 = vld [vmem:[%s5838_s19 + $0x68] sm:$0xff]  ;;  %v6241_v53 = vld [vmem:[%s5838_s19 + $0x98] sm:$0xff] }
 0x14e   : > { %vm4970_vm14 = vmpackc.low %vm1784_vm12, %vm1780_vm10  ;;  %vm1915_vm3 = vcmp.eq.s32.totalorder %v1669_v52, %v5821_v16 }
 0x14f   : > { %vm4972_vm15 = vmpackc.low %vm1783_vm11, %vm1779_vm13  ;;  %4971 = vmatprep.subr.msk.bf16.mxu1 %vm4970_vm14, %v5414_v31 }
 0x150   : > { %v1573_v58 = vpop.permute.xlu1 %1572  ;;  %4973 = vmatpush1.bf16.msk.msra.mxu1 %vm4972_vm15, %v5414_v31  ;;  %v1672_v59 = vpop.permute.xlu0 %1671 }
 0x151   : > { %vm1919_vm1 = vcmp.eq.s32.totalorder %v1672_v59, %v5821_v16  ;;  %vm1920_vm2 = vcmp.eq.s32.totalorder %v1672_v59, %v5831_v23  ;;  %819 = vperm.xlu1 %5339, %v648_v54   ;;  %816 = vperm.xlu0 %5338, %v647_v55   ;;  %vm1788_vm6 = vcmp.eq.s32.totalorder %v1573_v58, %v5831_v23  ;;  %v6248_v54 = vld [vmem:[%s5838_s19 + $0x60] sm:$0xff]  ;;  %v6251_v55 = vld [vmem:[%s5838_s19 + $0x88] sm:$0xff]  ;;  %v6263_v59 = vld [vmem:[%s5838_s19 + $0xb8] sm:$0xff] }
 0x152   : > { %vm5038_vm4 = vmpackc.low %vm1920_vm2, %vm1916_vm0  ;;  %vm1787_vm9 = vcmp.eq.s32.totalorder %v1573_v58, %v5821_v16 }
 0x153   : > { %vm5040_vm5 = vmpackc.low %vm1919_vm1, %vm1915_vm3  ;;  %5039 = vmatprep.subr.msk.bf16.mxu0 %vm5038_vm4, %v5414_v31 }
 0x154   : > { %v1675_v0 = vpop.permute.xlu1 %1674  ;;  %5041 = vmatpush1.bf16.msk.msra.mxu0 %vm5040_vm5, %v5414_v31  ;;  %v1576_v2 = vpop.permute.xlu0 %1575 }
 0x155   : > { %vm1791_vm7 = vcmp.eq.s32.totalorder %v1576_v2, %v5821_v16  ;;  %vm1792_vm8 = vcmp.eq.s32.totalorder %v1576_v2, %v5831_v23  ;;  %825 = vperm.xlu1 %5339, %v650_v60   ;;  %822 = vperm.xlu0 %5338, %v649_v61   ;;  %vm1924_vm12 = vcmp.eq.s32.totalorder %v1675_v0, %v5831_v23  ;;  %v6270_v60 = vld [vmem:[%s5838_s19 + $0x80] sm:$0xff]  ;;  %v6273_v61 = vld [vmem:[%s5838_s19 + $0xa8] sm:$0xff]  ;;  %v6286_v2 = vld [vmem:[%s5838_s19 + $0xd8] sm:$0xff] }
 0x156   : > { %vm4974_vm10 = vmpackc.low %vm1792_vm8, %vm1788_vm6  ;;  %vm1923_vm15 = vcmp.eq.s32.totalorder %v1675_v0, %v5821_v16 }
 0x157   : > { %vm4976_vm11 = vmpackc.low %vm1791_vm7, %vm1787_vm9  ;;  %4975 = vmatprep.subr.msk.bf16.mxu1 %vm4974_vm10, %v5414_v31 }
 0x158   : > { %v1579_v7 = vpop.permute.xlu1 %1578  ;;  %4977 = vmatpush1.bf16.msk.msra.mxu1 %vm4976_vm11, %v5414_v31  ;;  %v1678_v8 = vpop.permute.xlu0 %1677 }
 0x159   : > { %vm1927_vm13 = vcmp.eq.s32.totalorder %v1678_v8, %v5821_v16  ;;  %vm1928_vm14 = vcmp.eq.s32.totalorder %v1678_v8, %v5831_v23  ;;  %831 = vperm.xlu1 %5339, %v652_v3   ;;  %828 = vperm.xlu0 %5338, %v651_v4   ;;  %vm1796_vm2 = vcmp.eq.s32.totalorder %v1579_v7, %v5831_v23  ;;  %v6293_v3 = vld [vmem:[%s5838_s19 + $0xa0] sm:$0xff]  ;;  %v6296_v4 = vld [vmem:[%s5838_s19 + $0xc8] sm:$0xff]  ;;  %v6310_v8 = vld [vmem:[%s5838_s19 + $0xf8] sm:$0xff] }
 0x15a   : > { %vm5042_vm0 = vmpackc.low %vm1928_vm14, %vm1924_vm12  ;;  %vm1795_vm5 = vcmp.eq.s32.totalorder %v1579_v7, %v5821_v16 }
 0x15b   : > { %vm5044_vm1 = vmpackc.low %vm1927_vm13, %vm1923_vm15  ;;  %5043 = vmatprep.subr.msk.bf16.mxu0 %vm5042_vm0, %v5414_v31 }
 0x15c   : > { %v1681_v15 = vpop.permute.xlu1 %1680  ;;  %5045 = vmatpush1.bf16.msk.msra.mxu0 %vm5044_vm1, %v5414_v31  ;;  %v1582_v17 = vpop.permute.xlu0 %1581 }
 0x15d   : > { %vm1799_vm3 = vcmp.eq.s32.totalorder %v1582_v17, %v5821_v16  ;;  %vm1800_vm4 = vcmp.eq.s32.totalorder %v1582_v17, %v5831_v23  ;;  %837 = vperm.xlu1 %5339, %v654_v9   ;;  %834 = vperm.xlu0 %5338, %v653_v10   ;;  %vm1932_vm8 = vcmp.eq.s32.totalorder %v1681_v15, %v5831_v23  ;;  %v6317_v9 = vld [vmem:[%s5838_s19 + $0xc0] sm:$0xff]  ;;  %v6320_v10 = vld [vmem:[%s5838_s19 + $0xe8] sm:$0xff] }
 0x15e   : > { %vm4978_vm6 = vmpackc.low %vm1800_vm4, %vm1796_vm2  ;;  %vm1931_vm11 = vcmp.eq.s32.totalorder %v1681_v15, %v5821_v16  ;;  %vm856_vm4 = vcmp.eq.s32.totalorder %v5824_v19, %v5831_v23  ;;  %v6334_v17 = vld [vmem:[%s6331_s20 + $0x8] sm:$0xff] }
 0x15f   : > { %vm4980_vm7 = vmpackc.low %vm1799_vm3, %vm1795_vm5  ;;  %4979 = vmatprep.subr.msk.bf16.mxu1 %vm4978_vm6, %v5414_v31 }
 0x160   : > { %v1585_v24 = vpop.permute.xlu1 %1584  ;;  %4981 = vmatpush1.bf16.msk.msra.mxu1 %vm4980_vm7, %v5414_v31  ;;  %v1684_v25 = vpop.permute.xlu0 %1683 }
 0x161   : > { %vm1935_vm9 = vcmp.eq.s32.totalorder %v1684_v25, %v5821_v16  ;;  %vm1936_vm10 = vcmp.eq.s32.totalorder %v1684_v25, %v5831_v23  ;;  %843 = vperm.xlu1 %5339, %v656_v18   ;;  %840 = vperm.xlu0 %5338, %v655_v20   ;;  %vm1804_vm14 = vcmp.eq.s32.totalorder %v1585_v24, %v5831_v23  ;;  %v6341_v18 = vld [vmem:[%s5838_s19 + $0xe0] sm:$0xff] }
 0x162   : > { %vm5046_vm12 = vmpackc.low %vm1936_vm10, %vm1932_vm8  ;;  %vm1803_vm1 = vcmp.eq.s32.totalorder %v1585_v24, %v5821_v16  ;;  %vm855_vm8 = vcmp.eq.s32.totalorder %v5824_v19, %v5821_v16  ;;  %v6162_v19 = vld [vmem:[%s5838_s19 + $0x38] sm:$0xff] }
 0x163   : > { %vm5048_vm13 = vmpackc.low %vm1935_vm9, %vm1931_vm11  ;;  %5047 = vmatprep.subr.msk.bf16.mxu0 %vm5046_vm12, %v5414_v31  ;;  %vm852_vm11 = vcmp.eq.s32.totalorder %v5816_v12, %v5831_v23 }
 0x164   : > { %v1687_v28 = vpop.permute.xlu1 %1686  ;;  %5049 = vmatpush1.bf16.msk.msra.mxu0 %vm5048_vm13, %v5414_v31  ;;  %v1588_v29 = vpop.permute.xlu0 %1587  ;;  %vm851_vm13 = vcmp.eq.s32.totalorder %v5816_v12, %v5821_v16 }
 0x165   : > { %vm1807_vm15 = vcmp.eq.s32.totalorder %v1588_v29, %v5821_v16  ;;  %vm1808_vm0 = vcmp.eq.s32.totalorder %v1588_v29, %v5831_v23  ;;  %849 = vperm.xlu1 %5339, %v658_v26   ;;  %846 = vperm.xlu0 %5338, %v657_v27   ;;  %vm1940_vm5 = vcmp.eq.s32.totalorder %v1687_v28, %v5831_v23 }
 0x166   : > { %vm4982_vm2 = vmpackc.low %vm1808_vm0, %vm1804_vm14  ;;  %vm1939_vm9 = vcmp.eq.s32.totalorder %v1687_v28, %v5821_v16  ;;  %vm860_vm0 = vcmp.eq.s32.totalorder %v5814_v11, %v5831_v23 }
 0x167   : > { %vm4984_vm3 = vmpackc.low %vm1807_vm15, %vm1803_vm1  ;;  %4983 = vmatprep.subr.msk.bf16.mxu1 %vm4982_vm2, %v5414_v31 }
 0x168   : > { %v1591_v1 = vpop.permute.xlu1 %1590  ;;  %4985 = vmatpush1.bf16.msk.msra.mxu1 %vm4984_vm3, %v5414_v31  ;;  %v1690_v30 = vpop.permute.xlu0 %1689  ;;  %vm5054_vm15 = vmpackc.low %vm856_vm4, %vm852_vm11 }
 0x169   : > { %vm1943_vm6 = vcmp.eq.s32.totalorder %v1690_v30, %v5821_v16  ;;  %vm1944_vm7 = vcmp.eq.s32.totalorder %v1690_v30, %v5831_v23  ;;  %vm5056_vm1 = vmpackc.low %vm855_vm8, %vm851_vm13 }
 0x16a   : > { %vm5050_vm10 = vmpackc.low %vm1944_vm7, %vm1940_vm5  ;;  %vm1812_vm5 = vcmp.eq.s32.totalorder %v1591_v1, %v5831_v23  ;;  %vm1811_vm7 = vcmp.eq.s32.totalorder %v1591_v1, %v5821_v16 }
 0x16b   : > { %vm5052_vm12 = vmpackc.low %vm1943_vm6, %vm1939_vm9  ;;  %5051 = vmatprep.subr.msk.bf16.mxu0 %vm5050_vm10, %v5414_v31 }
 0x16c   : > { %v670_v32 = vpop.permute.xlu1 %669  ;;  %5053 = vmatpush1.bf16.msk.msra.mxu0 %vm5052_vm12, %v5414_v31  ;;  %v1594_v33 = vpop.permute.xlu0 %1593  ;;  %vm859_vm12 = vcmp.eq.s32.totalorder %v5814_v11, %v5821_v16 }
 0x16d   : > { %vm864_vm14 = vcmp.eq.s32.totalorder %v670_v32, %v5831_v23  ;;  %vm1815_vm2 = vcmp.eq.s32.totalorder %v1594_v33, %v5821_v16  ;;  %vm1816_vm3 = vcmp.eq.s32.totalorder %v1594_v33, %v5831_v23  ;;  %5055 = vmatprep.subr.msk.bf16.mxu0 %vm5054_vm15, %v5414_v31  ;;  %vm863_vm8 = vcmp.eq.s32.totalorder %v670_v32, %v5821_v16 }
 0x16e   : > { %vm5058_vm6 = vmpackc.low %vm864_vm14, %vm860_vm0 }
 0x16f   : > { %vm4986_vm4 = vmpackc.low %vm1816_vm3, %vm1812_vm5  ;;  %3469 = vmatmul.mubr.f32.vlgmr.msra.gmra.mrb[0].mxu0 %v6151_v34 }
 0x170   : > { %v676_v12 = vpop.permute.xlu1 %675  ;;  %vm4988_vm9 = vmpackc.low %vm1815_vm2, %vm1811_vm7  ;;  %4987 = vmatprep.subr.msk.bf16.mxu1 %vm4986_vm4, %v5414_v31  ;;  %v673_v35 = vpop.permute.xlu0 %672  ;;  %5057 = vmatpush1.bf16.msk.msra.mxu0 %vm5056_vm1, %v5414_v31 }
 0x171   : > { %vm872_vm10 = vcmp.eq.s32.totalorder %v676_v12, %v5831_v23  ;;  %4989 = vmatpush1.bf16.msk.msra.mxu1 %vm4988_vm9, %v5414_v31  ;;  %vm868_vm11 = vcmp.eq.s32.totalorder %v673_v35, %v5831_v23  ;;  %5059 = vmatprep.subr.msk.bf16.mxu0 %vm5058_vm6, %v5414_v31  ;;  %vm5060_vm13 = vmpackc.low %vm863_vm8, %vm859_vm12  ;;  %vm871_vm14 = vcmp.eq.s32.totalorder %v676_v12, %v5821_v16 }
 0x172   : > { %3517 = vmatprep.subr.mxu1 %v5415_v38  ;;  %3474 = vmatprep.mubr.f32.mxu0 %v6162_v19  ;;  %vm867_vm15 = vcmp.eq.s32.totalorder %v673_v35, %v5821_v16  ;;  %vm5062_vm0 = vmpackc.low %vm872_vm10, %vm868_vm11 }
 0x173   : > { %3475 = vmatmul.mubr.f32.gmra.mrb[2].mxu0 %v6168_v36  ;;  %vm5064_vm3 = vmpackc.low %vm871_vm14, %vm867_vm15 }
 0x174   : > { %v682_v39 = vpop.permute.xlu1 %681  ;;  %3356 = vmatmul.mubr.f32.vlgmr.msra.gmra.mrb[0].mxu1 %v6175_v37  ;;  %v679_v11 = vpop.permute.xlu0 %678  ;;  %5061 = vmatpush1.bf16.msk.msra.mxu0 %vm5060_vm13, %v5414_v31 }
 0x175   : > { %vm880_vm1 = vcmp.eq.s32.totalorder %v682_v39, %v5831_v23  ;;  %vm876_vm2 = vcmp.eq.s32.totalorder %v679_v11, %v5831_v23  ;;  %3518 = vmatpush1.msra.mxu1 %v5415_v38  ;;  %5063 = vmatprep.subr.msk.bf16.mxu0 %vm5062_vm0, %v5414_v31  ;;  %vm879_vm5 = vcmp.eq.s32.totalorder %v682_v39, %v5821_v16 }
 0x176   : > { %3361 = vmatprep.mubr.f32.mxu1 %v6184_v40  ;;  %3630 = vmatprep.subr.mxu1 %v5415_v38  ;;  %vm875_vm6 = vcmp.eq.s32.totalorder %v679_v11, %v5821_v16  ;;  %vm5066_vm7 = vmpackc.low %vm880_vm1, %vm876_vm2 }
 0x177   : > { %3480 = vmatprep.mubr.f32.mxu0 %v6194_v41  ;;  %vm5068_vm9 = vmpackc.low %vm879_vm5, %vm875_vm6 }
 0x178   : > { %v688_v44 = vpop.permute.xlu1 %687  ;;  %3362 = vmatmul.mubr.f32.gmra.mrb[2].mxu1 %v6201_v42  ;;  %v685_v46 = vpop.permute.xlu0 %684  ;;  %5065 = vmatpush1.bf16.msk.msra.mxu0 %vm5064_vm3, %v5414_v31 }
 0x179   : > { %vm888_vm4 = vcmp.eq.s32.totalorder %v688_v44, %v5831_v23  ;;  %vm884_vm8 = vcmp.eq.s32.totalorder %v685_v46, %v5831_v23  ;;  %5067 = vmatprep.subr.msk.bf16.mxu0 %vm5066_vm7, %v5414_v31  ;;  %3367 = vmatprep.mubr.f32.mxu1 %v6205_v43  ;;  %vm887_vm10 = vcmp.eq.s32.totalorder %v688_v44, %v5821_v16  ;;  %v6423_v44 = vld [vmem:[%s6331_s20 + $0x20] sm:$0xff] }
 0x17a   : > { %3481 = vmatmul.mubr.f32.gmra.mrb[4].mxu0 %v6212_v45  ;;  %vm883_vm11 = vcmp.eq.s32.totalorder %v685_v46, %v5821_v16  ;;  %vm5070_vm12 = vmpackc.low %vm888_vm4, %vm884_vm8  ;;  %v5341_v46 = vld [vmem:[%s5838_s19 + $0x18] sm:$0xff] }
 0x17b   : > { %3486 = vmatprep.mubr.f32.mxu0 %v6219_v47  ;;  %vm5072_vm15 = vmpackc.low %vm887_vm10, %vm883_vm11 }
 0x17c   : > { %v694_v50 = vpop.permute.xlu1 %693  ;;  %3368 = vmatmul.mubr.f32.gmra.mrb[4].mxu1 %v6226_v48  ;;  %v691_v52 = vpop.permute.xlu0 %690  ;;  %5069 = vmatpush1.bf16.msk.msra.mxu0 %vm5068_vm9, %v5414_v31 }
 0x17d   : > { %vm896_vm13 = vcmp.eq.s32.totalorder %v694_v50, %v5831_v23  ;;  %vm892_vm14 = vcmp.eq.s32.totalorder %v691_v52, %v5831_v23  ;;  %5071 = vmatprep.subr.msk.bf16.mxu0 %vm5070_vm12, %v5414_v31  ;;  %3373 = vmatprep.mubr.f32.mxu1 %v6229_v49  ;;  %vm895_vm0 = vcmp.eq.s32.totalorder %v694_v50, %v5821_v16  ;;  %v6436_v50 = vld [vmem:[%s6331_s20 + $0x48] sm:$0xff] }
 0x17e   : > { %3487 = vmatmul.mubr.f32.gmra.mrb[6].mxu0 %v6234_v51  ;;  %vm891_vm1 = vcmp.eq.s32.totalorder %v691_v52, %v5821_v16  ;;  %vm5074_vm2 = vmpackc.low %vm896_vm13, %vm892_vm14  ;;  %v6446_v52 = vld [vmem:[%s6331_s20 + $0x40] sm:$0xff] }
 0x17f   : > { %3492 = vmatprep.mubr.f32.mxu0 %v6241_v53  ;;  %vm5076_vm6 = vmpackc.low %vm895_vm0, %vm891_vm1 }
 0x180   : > { %v700_v56 = vpop.permute.xlu1 %699  ;;  %3374 = vmatmul.mubr.f32.gmra.mrb[6].mxu1 %v6248_v54  ;;  %v697_v58 = vpop.permute.xlu0 %696  ;;  %5073 = vmatpush1.bf16.msk.msra.mxu0 %vm5072_vm15, %v5414_v31 }
 0x181   : > { %vm904_vm3 = vcmp.eq.s32.totalorder %v700_v56, %v5831_v23  ;;  %vm900_vm5 = vcmp.eq.s32.totalorder %v697_v58, %v5831_v23  ;;  %5075 = vmatprep.subr.msk.bf16.mxu0 %vm5074_vm2, %v5414_v31  ;;  %3379 = vmatprep.mubr.f32.mxu1 %v6251_v55  ;;  %vm903_vm7 = vcmp.eq.s32.totalorder %v700_v56, %v5821_v16 }
 0x182   : > { %3493 = vmatmul.mubr.f32.gmra.mrb[8].mxu0 %v6256_v57  ;;  %vm899_vm4 = vcmp.eq.s32.totalorder %v697_v58, %v5821_v16  ;;  %vm5078_vm8 = vmpackc.low %vm904_vm3, %vm900_vm5 }
 0x183   : > { %3498 = vmatprep.mubr.f32.mxu0 %v6263_v59  ;;  %vm5080_vm11 = vmpackc.low %vm903_vm7, %vm899_vm4 }
 0x184   : > { %v706_v62 = vpop.permute.xlu1 %705  ;;  %3380 = vmatmul.mubr.f32.gmra.mrb[8].mxu1 %v6270_v60  ;;  %v703_v0 = vpop.permute.xlu0 %702  ;;  %5077 = vmatpush1.bf16.msk.msra.mxu0 %vm5076_vm6, %v5414_v31 }
 0x185   : > { %vm912_vm9 = vcmp.eq.s32.totalorder %v706_v62, %v5831_v23  ;;  %vm908_vm10 = vcmp.eq.s32.totalorder %v703_v0, %v5831_v23  ;;  %5079 = vmatprep.subr.msk.bf16.mxu0 %vm5078_vm8, %v5414_v31  ;;  %3385 = vmatprep.mubr.f32.mxu1 %v6273_v61  ;;  %vm911_vm12 = vcmp.eq.s32.totalorder %v706_v62, %v5821_v16 }
 0x186   : > { %3499 = vmatmul.mubr.f32.gmra.mrb[10].mxu0 %v6278_v63  ;;  %vm907_vm13 = vcmp.eq.s32.totalorder %v703_v0, %v5821_v16  ;;  %vm5082_vm14 = vmpackc.low %vm912_vm9, %vm908_vm10 }
 0x187   : > { %3504 = vmatprep.mubr.f32.mxu0 %v6286_v2  ;;  %vm5084_vm1 = vmpackc.low %vm911_vm12, %vm907_vm13 }
 0x188   : > { %v712_v5 = vpop.permute.xlu1 %711  ;;  %3386 = vmatmul.mubr.f32.gmra.mrb[10].mxu1 %v6293_v3  ;;  %v709_v7 = vpop.permute.xlu0 %708  ;;  %5081 = vmatpush1.bf16.msk.msra.mxu0 %vm5080_vm11, %v5414_v31 }
 0x189   : > { %vm920_vm15 = vcmp.eq.s32.totalorder %v712_v5, %v5831_v23  ;;  %vm916_vm0 = vcmp.eq.s32.totalorder %v709_v7, %v5831_v23  ;;  %5083 = vmatprep.subr.msk.bf16.mxu0 %vm5082_vm14, %v5414_v31  ;;  %3391 = vmatprep.mubr.f32.mxu1 %v6296_v4  ;;  %vm919_vm2 = vcmp.eq.s32.totalorder %v712_v5, %v5821_v16 }
 0x18a   : > { %3505 = vmatmul.mubr.f32.gmra.mrb[12].mxu0 %v6303_v6  ;;  %vm915_vm3 = vcmp.eq.s32.totalorder %v709_v7, %v5821_v16  ;;  %vm5086_vm5 = vmpackc.low %vm920_vm15, %vm916_vm0  ;;  %v6533_v7 = vld [vmem:[%s6331_s20 + $0x18] sm:$0xff] }
 0x18b   : > { %3510 = vmatprep.mubr.f32.mxu0 %v6310_v8  ;;  %vm5088_vm4 = vmpackc.low %vm919_vm2, %vm915_vm3 }
 0x18c   : > { %v718_v13 = vpop.permute.xlu1 %717  ;;  %3392 = vmatmul.mubr.f32.gmra.mrb[12].mxu1 %v6317_v9  ;;  %v715_v15 = vpop.permute.xlu0 %714  ;;  %5085 = vmatpush1.bf16.msk.msra.mxu0 %vm5084_vm1, %v5414_v31 }
 0x18d   : > { %vm928_vm6 = vcmp.eq.s32.totalorder %v718_v13, %v5831_v23  ;;  %vm924_vm7 = vcmp.eq.s32.totalorder %v715_v15, %v5831_v23  ;;  %5087 = vmatprep.subr.msk.bf16.mxu0 %vm5086_vm5, %v5414_v31  ;;  %3397 = vmatprep.mubr.f32.mxu1 %v6320_v10  ;;  %vm927_vm8 = vcmp.eq.s32.totalorder %v718_v13, %v5821_v16 }
 0x18e   : > { %3511 = vmatmul.mubr.f32.gmra.mrb[14].mxu0 %v6325_v14  ;;  %vm923_vm9 = vcmp.eq.s32.totalorder %v715_v15, %v5821_v16  ;;  %vm5090_vm10 = vmpackc.low %vm928_vm6, %vm924_vm7 }
 0x18f   : > { %3807 = vmatprep.mubr.f32.mxu0 %v6334_v17  ;;  %vm5092_vm13 = vmpackc.low %vm927_vm8, %vm923_vm9 }
 0x190   : > { %v724_v20 = vpop.permute.xlu1 %723  ;;  %3398 = vmatmul.mubr.f32.gmra.mrb[14].mxu1 %v6341_v18  ;;  %v721_v21 = vpop.permute.xlu0 %720  ;;  %5089 = vmatpush1.bf16.msk.msra.mxu0 %vm5088_vm4, %v5414_v31 }
 0x191   : > { %vm936_vm11 = vcmp.eq.s32.totalorder %v724_v20, %v5831_v23  ;;  %vm932_vm12 = vcmp.eq.s32.totalorder %v721_v21, %v5831_v23  ;;  %5091 = vmatprep.subr.msk.bf16.mxu0 %vm5090_vm10, %v5414_v31  ;;  %3581 = vmatprep.mubr.f32.mxu1 %v5340_v22  ;;  %vm935_vm14 = vcmp.eq.s32.totalorder %v724_v20, %v5821_v16  ;;  %v2214_v22 = vld [vmem:[%s6331_s20 + $0x58] sm:$0xff] }
 0x192   : > { %vm931_vm15 = vcmp.eq.s32.totalorder %v721_v21, %v5821_v16  ;;  %vm5094_vm0 = vmpackc.low %vm936_vm11, %vm932_vm12  ;;  %v2209_v21 = vld [vmem:[%s6331_s20 + $0x30] sm:$0xff] }
 0x193   : > { %vm5096_vm3 = vmpackc.low %vm935_vm14, %vm931_vm15 }
 0x194   : > { %v730_v24 = vpop.permute.xlu1 %729  ;;  %3582 = vmatmul.mubr.f32.vlgmr.msra.gmra.mrb[16].mxu1 %v6175_v37  ;;  %v727_v25 = vpop.permute.xlu0 %726  ;;  %5093 = vmatpush1.bf16.msk.msra.mxu0 %vm5092_vm13, %v5414_v31 }
 0x195   : > { %vm944_vm1 = vcmp.eq.s32.totalorder %v730_v24, %v5831_v23  ;;  %vm940_vm2 = vcmp.eq.s32.totalorder %v727_v25, %v5831_v23  ;;  %3631 = vmatpush1.msra.mxu1 %v5415_v38  ;;  %5095 = vmatprep.subr.msk.bf16.mxu0 %vm5094_vm0, %v5414_v31  ;;  %vm943_vm5 = vcmp.eq.s32.totalorder %v730_v24, %v5821_v16  ;;  %v2218_v24 = vld [vmem:[%s6331_s20 + $0x78] sm:$0xff] }
 0x196   : > { %3587 = vmatprep.mubr.f32.mxu1 %v6184_v40  ;;  %3969 = vmatprep.subr.mxu1 %v5415_v38  ;;  %vm939_vm6 = vcmp.eq.s32.totalorder %v727_v25, %v5821_v16  ;;  %vm5098_vm7 = vmpackc.low %vm944_vm1, %vm940_vm2  ;;  %v6408_v40 = vld [vmem:[%s6331_s20] sm:$0xff]  ;;  %v2217_v25 = vld [vmem:[%s6331_s20 + $0x70] sm:$0xff] }
 0x197   : > { %vm5100_vm9 = vmpackc.low %vm943_vm5, %vm939_vm6 }
 0x198   : > { %v736_v26 = vpop.permute.xlu1 %735  ;;  %3588 = vmatmul.mubr.f32.gmra.mrb[18].mxu1 %v6201_v42  ;;  %v733_v27 = vpop.permute.xlu0 %732  ;;  %5097 = vmatpush1.bf16.msk.msra.mxu0 %vm5096_vm3, %v5414_v31  ;;  %v6416_v42 = vld [vmem:[%s6331_s20 + $0x28] sm:$0xff] }
 0x199   : > { %vm952_vm4 = vcmp.eq.s32.totalorder %v736_v26, %v5831_v23  ;;  %vm948_vm8 = vcmp.eq.s32.totalorder %v733_v27, %v5831_v23  ;;  %5099 = vmatprep.subr.msk.bf16.mxu0 %vm5098_vm7, %v5414_v31  ;;  %3593 = vmatprep.mubr.f32.mxu1 %v6205_v43  ;;  %vm951_vm10 = vcmp.eq.s32.totalorder %v736_v26, %v5821_v16  ;;  %v2222_v26 = vld [vmem:[%s6331_s20 + $0x98] sm:$0xff] }
 0x19a   : > { %vm947_vm11 = vcmp.eq.s32.totalorder %v733_v27, %v5821_v16  ;;  %vm5102_vm12 = vmpackc.low %vm952_vm4, %vm948_vm8  ;;  %v2221_v27 = vld [vmem:[%s6331_s20 + $0x90] sm:$0xff] }
 0x19b   : > { %vm5104_vm15 = vmpackc.low %vm951_vm10, %vm947_vm11 }
 0x19c   : > { %v742_v28 = vpop.permute.xlu1 %741  ;;  %3594 = vmatmul.mubr.f32.gmra.mrb[20].mxu1 %v6226_v48  ;;  %v739_v29 = vpop.permute.xlu0 %738  ;;  %5101 = vmatpush1.bf16.msk.msra.mxu0 %vm5100_vm9, %v5414_v31 }
 0x19d   : > { %vm960_vm13 = vcmp.eq.s32.totalorder %v742_v28, %v5831_v23  ;;  %vm956_vm14 = vcmp.eq.s32.totalorder %v739_v29, %v5831_v23  ;;  %5103 = vmatprep.subr.msk.bf16.mxu0 %vm5102_vm12, %v5414_v31  ;;  %3599 = vmatprep.mubr.f32.mxu1 %v6229_v49  ;;  %vm959_vm0 = vcmp.eq.s32.totalorder %v742_v28, %v5821_v16  ;;  %v2226_v28 = vld [vmem:[%s6331_s20 + $0xb8] sm:$0xff] }
 0x19e   : > { %vm955_vm1 = vcmp.eq.s32.totalorder %v739_v29, %v5821_v16  ;;  %vm5106_vm2 = vmpackc.low %vm960_vm13, %vm956_vm14  ;;  %v2225_v29 = vld [vmem:[%s6331_s20 + $0xb0] sm:$0xff] }
 0x19f   : > { %vm5108_vm6 = vmpackc.low %vm959_vm0, %vm955_vm1 }
 0x1a0   : > { %v748_v1 = vpop.permute.xlu1 %747  ;;  %3600 = vmatmul.mubr.f32.gmra.mrb[22].mxu1 %v6248_v54  ;;  %v745_v30 = vpop.permute.xlu0 %744  ;;  %5105 = vmatpush1.bf16.msk.msra.mxu0 %vm5104_vm15, %v5414_v31 }
 0x1a1   : > { %vm968_vm3 = vcmp.eq.s32.totalorder %v748_v1, %v5831_v23  ;;  %vm964_vm5 = vcmp.eq.s32.totalorder %v745_v30, %v5831_v23  ;;  %5107 = vmatprep.subr.msk.bf16.mxu0 %vm5106_vm2, %v5414_v31  ;;  %3605 = vmatprep.mubr.f32.mxu1 %v6251_v55  ;;  %vm967_vm7 = vcmp.eq.s32.totalorder %v748_v1, %v5821_v16  ;;  %v2230_v1 = vld [vmem:[%s6331_s20 + $0xd8] sm:$0xff] }
 0x1a2   : > { %vm963_vm4 = vcmp.eq.s32.totalorder %v745_v30, %v5821_v16  ;;  %vm5110_vm8 = vmpackc.low %vm968_vm3, %vm964_vm5  ;;  %v2229_v30 = vld [vmem:[%s6331_s20 + $0xd0] sm:$0xff] }
 0x1a3   : > { %vm5112_vm11 = vmpackc.low %vm967_vm7, %vm963_vm4 }
 0x1a4   : > { %v754_v32 = vpop.permute.xlu1 %753  ;;  %3606 = vmatmul.mubr.f32.gmra.mrb[24].mxu1 %v6270_v60  ;;  %v751_v33 = vpop.permute.xlu0 %750  ;;  %5109 = vmatpush1.bf16.msk.msra.mxu0 %vm5108_vm6, %v5414_v31 }
 0x1a5   : > { %vm976_vm9 = vcmp.eq.s32.totalorder %v754_v32, %v5831_v23  ;;  %vm972_vm10 = vcmp.eq.s32.totalorder %v751_v33, %v5831_v23  ;;  %5111 = vmatprep.subr.msk.bf16.mxu0 %vm5110_vm8, %v5414_v31  ;;  %3611 = vmatprep.mubr.f32.mxu1 %v6273_v61  ;;  %vm975_vm12 = vcmp.eq.s32.totalorder %v754_v32, %v5821_v16  ;;  %v2234_v32 = vld [vmem:[%s6331_s20 + $0xf8] sm:$0xff] }
 0x1a6   : > { %vm971_vm13 = vcmp.eq.s32.totalorder %v751_v33, %v5821_v16  ;;  %vm5114_vm14 = vmpackc.low %vm976_vm9, %vm972_vm10  ;;  %v2233_v33 = vld [vmem:[%s6331_s20 + $0xf0] sm:$0xff] }
 0x1a7   : > { %vm5116_vm1 = vmpackc.low %vm975_vm12, %vm971_vm13 }
 0x1a8   : > { %v760_v12 = vpop.permute.xlu1 %759  ;;  %3612 = vmatmul.mubr.f32.gmra.mrb[26].mxu1 %v6293_v3  ;;  %v757_v35 = vpop.permute.xlu0 %756  ;;  %5113 = vmatpush1.bf16.msk.msra.mxu0 %vm5112_vm11, %v5414_v31 }
 0x1a9   : > { %vm984_vm15 = vcmp.eq.s32.totalorder %v760_v12, %v5831_v23  ;;  %vm980_vm0 = vcmp.eq.s32.totalorder %v757_v35, %v5831_v23  ;;  %5115 = vmatprep.subr.msk.bf16.mxu0 %vm5114_vm14, %v5414_v31  ;;  %3617 = vmatprep.mubr.f32.mxu1 %v6296_v4  ;;  %vm983_vm2 = vcmp.eq.s32.totalorder %v760_v12, %v5821_v16 }
 0x1aa   : > { %vm979_vm3 = vcmp.eq.s32.totalorder %v757_v35, %v5821_v16  ;;  %vm5118_vm5 = vmpackc.low %vm984_vm15, %vm980_vm0 }
 0x1ab   : > { %vm5120_vm4 = vmpackc.low %vm983_vm2, %vm979_vm3 }
 0x1ac   : > { %v766_v37 = vpop.permute.xlu1 %765  ;;  %3618 = vmatmul.mubr.f32.gmra.mrb[28].mxu1 %v6317_v9  ;;  %v763_v39 = vpop.permute.xlu0 %762  ;;  %5117 = vmatpush1.bf16.msk.msra.mxu0 %vm5116_vm1, %v5414_v31 }
 0x1ad   : > { %vm992_vm6 = vcmp.eq.s32.totalorder %v766_v37, %v5831_v23  ;;  %vm988_vm7 = vcmp.eq.s32.totalorder %v763_v39, %v5831_v23  ;;  %5119 = vmatprep.subr.msk.bf16.mxu0 %vm5118_vm5, %v5414_v31  ;;  %3623 = vmatprep.mubr.f32.mxu1 %v6320_v10  ;;  %vm991_vm8 = vcmp.eq.s32.totalorder %v766_v37, %v5821_v16 }
 0x1ae   : > { %vm987_vm9 = vcmp.eq.s32.totalorder %v763_v39, %v5821_v16  ;;  %vm5122_vm10 = vmpackc.low %vm992_vm6, %vm988_vm7 }
 0x1af   : > { %3808 = vmatmul.mubr.f32.vlgmr.msra.gmra.mrb[0].mxu0 %v6408_v40  ;;  %vm5124_vm13 = vmpackc.low %vm991_vm8, %vm987_vm9 }
 0x1b0   : > { %v772_v11 = vpop.permute.xlu1 %771  ;;  %3624 = vmatmul.mubr.f32.gmra.mrb[30].mxu1 %v6341_v18  ;;  %v769_v43 = vpop.permute.xlu0 %768  ;;  %5121 = vmatpush1.bf16.msk.msra.mxu0 %vm5120_vm4, %v5414_v31 }
 0x1b1   : > { %vm1000_vm11 = vcmp.eq.s32.totalorder %v772_v11, %v5831_v23  ;;  %vm996_vm12 = vcmp.eq.s32.totalorder %v769_v43, %v5831_v23  ;;  %5123 = vmatprep.subr.msk.bf16.mxu0 %vm5122_vm10, %v5414_v31  ;;  %3694 = vmatprep.mubr.f32.mxu1 %v5341_v46  ;;  %vm999_vm14 = vcmp.eq.s32.totalorder %v772_v11, %v5821_v16 }
 0x1b2   : > { %3813 = vmatprep.mubr.f32.mxu0 %v6416_v42  ;;  %vm995_vm15 = vcmp.eq.s32.totalorder %v769_v43, %v5821_v16  ;;  %vm5126_vm0 = vmpackc.low %vm1000_vm11, %vm996_vm12 }
 0x1b3   : > { %3814 = vmatmul.mubr.f32.gmra.mrb[2].mxu0 %v6423_v44  ;;  %vm5128_vm3 = vmpackc.low %vm999_vm14, %vm995_vm15 }
 0x1b4   : > { %v778_v48 = vpop.permute.xlu1 %777  ;;  %3695 = vmatmul.mubr.f32.vlgmr.msra.gmra.mrb[16].mxu1 %v6151_v34  ;;  %v775_v49 = vpop.permute.xlu0 %774  ;;  %5125 = vmatpush1.bf16.msk.msra.mxu0 %vm5124_vm13, %v5414_v31 }
 0x1b5   : > { %vm1008_vm1 = vcmp.eq.s32.totalorder %v778_v48, %v5831_v23  ;;  %vm1004_vm2 = vcmp.eq.s32.totalorder %v775_v49, %v5831_v23  ;;  %3970 = vmatpush1.msra.mxu1 %v5415_v38  ;;  %5127 = vmatprep.subr.msk.bf16.mxu0 %vm5126_vm0, %v5414_v31  ;;  %vm1007_vm5 = vcmp.eq.s32.totalorder %v778_v48, %v5821_v16 }
 0x1b6   : > { %3700 = vmatprep.mubr.f32.mxu1 %v6162_v19  ;;  %4082 = vmatprep.subr.mxu1 %v5415_v38  ;;  %vm1003_vm6 = vcmp.eq.s32.totalorder %v775_v49, %v5821_v16  ;;  %vm5130_vm7 = vmpackc.low %vm1008_vm1, %vm1004_vm2  ;;  %v6453_v19 = vld [vmem:[%s6331_s20 + $0x68] sm:$0xff] }
 0x1b7   : > { %3819 = vmatprep.mubr.f32.mxu0 %v6436_v50  ;;  %vm5132_vm9 = vmpackc.low %vm1007_vm5, %vm1003_vm6 }
 0x1b8   : > { %v784_v34 = vpop.permute.xlu1 %783  ;;  %3701 = vmatmul.mubr.f32.gmra.mrb[18].mxu1 %v6168_v36  ;;  %v781_v54 = vpop.permute.xlu0 %780  ;;  %5129 = vmatpush1.bf16.msk.msra.mxu0 %vm5128_vm3, %v5414_v31  ;;  %v6462_v36 = vld [vmem:[%s6331_s20 + $0x60] sm:$0xff] }
 0x1b9   : > { %vm1016_vm4 = vcmp.eq.s32.totalorder %v784_v34, %v5831_v23  ;;  %vm1012_vm8 = vcmp.eq.s32.totalorder %v781_v54, %v5831_v23  ;;  %5131 = vmatprep.subr.msk.bf16.mxu0 %vm5130_vm7, %v5414_v31  ;;  %3706 = vmatprep.mubr.f32.mxu1 %v6194_v41  ;;  %vm1015_vm10 = vcmp.eq.s32.totalorder %v784_v34, %v5821_v16  ;;  %v6469_v41 = vld [vmem:[%s6331_s20 + $0x88] sm:$0xff] }
 0x1ba   : > { %3820 = vmatmul.mubr.f32.gmra.mrb[4].mxu0 %v6446_v52  ;;  %vm1011_vm11 = vcmp.eq.s32.totalorder %v781_v54, %v5821_v16  ;;  %vm5134_vm12 = vmpackc.low %vm1016_vm4, %vm1012_vm8 }
 0x1bb   : > { %3825 = vmatprep.mubr.f32.mxu0 %v6453_v19  ;;  %vm5136_vm15 = vmpackc.low %vm1015_vm10, %vm1011_vm11 }
 0x1bc   : > { %v790_v55 = vpop.permute.xlu1 %789  ;;  %3707 = vmatmul.mubr.f32.gmra.mrb[20].mxu1 %v6212_v45  ;;  %v787_v56 = vpop.permute.xlu0 %786  ;;  %5133 = vmatpush1.bf16.msk.msra.mxu0 %vm5132_vm9, %v5414_v31  ;;  %v6478_v45 = vld [vmem:[%s6331_s20 + $0x80] sm:$0xff] }
 0x1bd   : > { %vm1024_vm13 = vcmp.eq.s32.totalorder %v790_v55, %v5831_v23  ;;  %vm1020_vm14 = vcmp.eq.s32.totalorder %v787_v56, %v5831_v23  ;;  %5135 = vmatprep.subr.msk.bf16.mxu0 %vm5134_vm12, %v5414_v31  ;;  %3712 = vmatprep.mubr.f32.mxu1 %v6219_v47  ;;  %vm1023_vm0 = vcmp.eq.s32.totalorder %v790_v55, %v5821_v16  ;;  %v6485_v47 = vld [vmem:[%s6331_s20 + $0xa8] sm:$0xff] }
 0x1be   : > { %3826 = vmatmul.mubr.f32.gmra.mrb[6].mxu0 %v6462_v36  ;;  %vm1019_vm1 = vcmp.eq.s32.totalorder %v787_v56, %v5821_v16  ;;  %vm5138_vm2 = vmpackc.low %vm1024_vm13, %vm1020_vm14 }
 0x1bf   : > { %3831 = vmatprep.mubr.f32.mxu0 %v6469_v41  ;;  %vm5140_vm6 = vmpackc.low %vm1023_vm0, %vm1019_vm1 }
 0x1c0   : > { %v796_v58 = vpop.permute.xlu1 %795  ;;  %3713 = vmatmul.mubr.f32.gmra.mrb[22].mxu1 %v6234_v51  ;;  %v793_v60 = vpop.permute.xlu0 %792  ;;  %5137 = vmatpush1.bf16.msk.msra.mxu0 %vm5136_vm15, %v5414_v31  ;;  %v6494_v51 = vld [vmem:[%s6331_s20 + $0xa0] sm:$0xff] }
 0x1c1   : > { %vm1032_vm3 = vcmp.eq.s32.totalorder %v796_v58, %v5831_v23  ;;  %vm1028_vm5 = vcmp.eq.s32.totalorder %v793_v60, %v5831_v23  ;;  %5139 = vmatprep.subr.msk.bf16.mxu0 %vm5138_vm2, %v5414_v31  ;;  %3718 = vmatprep.mubr.f32.mxu1 %v6241_v53  ;;  %vm1031_vm7 = vcmp.eq.s32.totalorder %v796_v58, %v5821_v16  ;;  %v6501_v53 = vld [vmem:[%s6331_s20 + $0xc8] sm:$0xff] }
 0x1c2   : > { %3832 = vmatmul.mubr.f32.gmra.mrb[8].mxu0 %v6478_v45  ;;  %vm1027_vm4 = vcmp.eq.s32.totalorder %v793_v60, %v5821_v16  ;;  %vm5142_vm8 = vmpackc.low %vm1032_vm3, %vm1028_vm5 }
 0x1c3   : > { %3837 = vmatprep.mubr.f32.mxu0 %v6485_v47  ;;  %vm5144_vm11 = vmpackc.low %vm1031_vm7, %vm1027_vm4 }
 0x1c4   : > { %v802_v61 = vpop.permute.xlu1 %801  ;;  %3719 = vmatmul.mubr.f32.gmra.mrb[24].mxu1 %v6256_v57  ;;  %v799_v62 = vpop.permute.xlu0 %798  ;;  %5141 = vmatpush1.bf16.msk.msra.mxu0 %vm5140_vm6, %v5414_v31  ;;  %v6510_v57 = vld [vmem:[%s6331_s20 + $0xc0] sm:$0xff] }
 0x1c5   : > { %vm1040_vm9 = vcmp.eq.s32.totalorder %v802_v61, %v5831_v23  ;;  %vm1036_vm10 = vcmp.eq.s32.totalorder %v799_v62, %v5831_v23  ;;  %5143 = vmatprep.subr.msk.bf16.mxu0 %vm5142_vm8, %v5414_v31  ;;  %3724 = vmatprep.mubr.f32.mxu1 %v6263_v59  ;;  %vm1039_vm12 = vcmp.eq.s32.totalorder %v802_v61, %v5821_v16  ;;  %v6517_v59 = vld [vmem:[%s6331_s20 + $0xe8] sm:$0xff] }
 0x1c6   : > { %3838 = vmatmul.mubr.f32.gmra.mrb[10].mxu0 %v6494_v51  ;;  %vm1035_vm13 = vcmp.eq.s32.totalorder %v799_v62, %v5821_v16  ;;  %vm5146_vm14 = vmpackc.low %vm1040_vm9, %vm1036_vm10 }
 0x1c7   : > { %3843 = vmatprep.mubr.f32.mxu0 %v6501_v53  ;;  %vm5148_vm1 = vmpackc.low %vm1039_vm12, %vm1035_vm13 }
 0x1c8   : > { %v808_v0 = vpop.permute.xlu1 %807  ;;  %3725 = vmatmul.mubr.f32.gmra.mrb[26].mxu1 %v6278_v63  ;;  %v805_v3 = vpop.permute.xlu0 %804  ;;  %5145 = vmatpush1.bf16.msk.msra.mxu0 %vm5144_vm11, %v5414_v31  ;;  %v6526_v63 = vld [vmem:[%s6331_s20 + $0xe0] sm:$0xff] }
 0x1c9   : > { %vm1048_vm15 = vcmp.eq.s32.totalorder %v808_v0, %v5831_v23  ;;  %vm1044_vm0 = vcmp.eq.s32.totalorder %v805_v3, %v5831_v23  ;;  %5147 = vmatprep.subr.msk.bf16.mxu0 %vm5146_vm14, %v5414_v31  ;;  %3730 = vmatprep.mubr.f32.mxu1 %v6286_v2  ;;  %vm1047_vm2 = vcmp.eq.s32.totalorder %v808_v0, %v5821_v16 }
 0x1ca   : > { %3844 = vmatmul.mubr.f32.gmra.mrb[12].mxu0 %v6510_v57  ;;  %vm1043_vm3 = vcmp.eq.s32.totalorder %v805_v3, %v5821_v16  ;;  %vm5150_vm5 = vmpackc.low %vm1048_vm15, %vm1044_vm0 }
 0x1cb   : > { %3849 = vmatprep.mubr.f32.mxu0 %v6517_v59  ;;  %vm5152_vm4 = vmpackc.low %vm1047_vm2, %vm1043_vm3 }
 0x1cc   : > { %v814_v4 = vpop.permute.xlu1 %813  ;;  %3731 = vmatmul.mubr.f32.gmra.mrb[28].mxu1 %v6303_v6  ;;  %v811_v5 = vpop.permute.xlu0 %810  ;;  %5149 = vmatpush1.bf16.msk.msra.mxu0 %vm5148_vm1, %v5414_v31 }
 0x1cd   : > { %vm1056_vm6 = vcmp.eq.s32.totalorder %v814_v4, %v5831_v23  ;;  %vm1052_vm7 = vcmp.eq.s32.totalorder %v811_v5, %v5831_v23  ;;  %5151 = vmatprep.subr.msk.bf16.mxu0 %vm5150_vm5, %v5414_v31  ;;  %3736 = vmatprep.mubr.f32.mxu1 %v6310_v8  ;;  %vm1055_vm8 = vcmp.eq.s32.totalorder %v814_v4, %v5821_v16 }
 0x1ce   : > { %3850 = vmatmul.mubr.f32.gmra.mrb[14].mxu0 %v6526_v63  ;;  %vm1051_vm9 = vcmp.eq.s32.totalorder %v811_v5, %v5821_v16  ;;  %vm5154_vm10 = vmpackc.low %vm1056_vm6, %vm1052_vm7 }
 0x1cf   : > { %3920 = vmatprep.mubr.f32.mxu0 %v6533_v7  ;;  %vm5156_vm13 = vmpackc.low %vm1055_vm8, %vm1051_vm9 }
 0x1d0   : > { %v820_v2 = vpop.permute.xlu1 %819  ;;  %3737 = vmatmul.mubr.f32.gmra.mrb[30].mxu1 %v6325_v14  ;;  %v817_v6 = vpop.permute.xlu0 %816  ;;  %5153 = vmatpush1.bf16.msk.msra.mxu0 %vm5152_vm4, %v5414_v31 }
 0x1d1   : > { %vm1064_vm11 = vcmp.eq.s32.totalorder %v820_v2, %v5831_v23  ;;  %vm1060_vm12 = vcmp.eq.s32.totalorder %v817_v6, %v5831_v23  ;;  %5155 = vmatprep.subr.msk.bf16.mxu0 %vm5154_vm10, %v5414_v31  ;;  %4033 = vmatprep.mubr.f32.mxu1 %v6334_v17  ;;  %vm1063_vm14 = vcmp.eq.s32.totalorder %v820_v2, %v5821_v16 }
 0x1d2   : > { %vm1059_vm15 = vcmp.eq.s32.totalorder %v817_v6, %v5821_v16  ;;  %vm5158_vm0 = vmpackc.low %vm1064_vm11, %vm1060_vm12 }
 0x1d3   : > { %vm5160_vm3 = vmpackc.low %vm1063_vm14, %vm1059_vm15 }
 0x1d4   : > { %v826_v8 = vpop.permute.xlu1 %825  ;;  %4034 = vmatmul.mubr.f32.vlgmr.msra.gmra.mrb[16].mxu1 %v6408_v40  ;;  %v823_v9 = vpop.permute.xlu0 %822  ;;  %5157 = vmatpush1.bf16.msk.msra.mxu0 %vm5156_vm13, %v5414_v31 }
 0x1d5   : > { %vm1072_vm1 = vcmp.eq.s32.totalorder %v826_v8, %v5831_v23  ;;  %vm1068_vm2 = vcmp.eq.s32.totalorder %v823_v9, %v5831_v23  ;;  %4083 = vmatpush1.msra.mxu1 %v5415_v38  ;;  %5159 = vmatprep.subr.msk.bf16.mxu0 %vm5158_vm0, %v5414_v31  ;;  %vm1071_vm5 = vcmp.eq.s32.totalorder %v826_v8, %v5821_v16 }
 0x1d6   : > { %4039 = vmatprep.mubr.f32.mxu1 %v6416_v42  ;;  %vm1067_vm6 = vcmp.eq.s32.totalorder %v823_v9, %v5821_v16  ;;  %vm5162_vm7 = vmpackc.low %vm1072_vm1, %vm1068_vm2 }
 0x1d7   : > { %vm5164_vm9 = vmpackc.low %vm1071_vm5, %vm1067_vm6 }
 0x1d8   : > { %v832_v10 = vpop.permute.xlu1 %831  ;;  %4040 = vmatmul.mubr.f32.gmra.mrb[18].mxu1 %v6423_v44  ;;  %v829_v13 = vpop.permute.xlu0 %828  ;;  %5161 = vmatpush1.bf16.msk.msra.mxu0 %vm5160_vm3, %v5414_v31 }
 0x1d9   : > { %vm1080_vm4 = vcmp.eq.s32.totalorder %v832_v10, %v5831_v23  ;;  %vm1076_vm8 = vcmp.eq.s32.totalorder %v829_v13, %v5831_v23  ;;  %5163 = vmatprep.subr.msk.bf16.mxu0 %vm5162_vm7, %v5414_v31  ;;  %4045 = vmatprep.mubr.f32.mxu1 %v6436_v50  ;;  %vm1079_vm10 = vcmp.eq.s32.totalorder %v832_v10, %v5821_v16 }
 0x1da   : > { %vm1075_vm11 = vcmp.eq.s32.totalorder %v829_v13, %v5821_v16  ;;  %vm5166_vm12 = vmpackc.low %vm1080_vm4, %vm1076_vm8 }
 0x1db   : > { %vm5168_vm15 = vmpackc.low %vm1079_vm10, %vm1075_vm11 }
 0x1dc   : > { %v838_v38 = vpop.permute.xlu1 %837  ;;  %4046 = vmatmul.mubr.f32.gmra.mrb[20].mxu1 %v6446_v52  ;;  %v835_v14 = vpop.permute.xlu0 %834  ;;  %5165 = vmatpush1.bf16.msk.msra.mxu0 %vm5164_vm9, %v5414_v31 }
 0x1dd   : > { %vm1088_vm13 = vcmp.eq.s32.totalorder %v838_v38, %v5831_v23  ;;  %vm1084_vm14 = vcmp.eq.s32.totalorder %v835_v14, %v5831_v23  ;;  %5167 = vmatprep.subr.msk.bf16.mxu0 %vm5166_vm12, %v5414_v31  ;;  %4051 = vmatprep.mubr.f32.mxu1 %v6453_v19  ;;  %vm1087_vm0 = vcmp.eq.s32.totalorder %v838_v38, %v5821_v16 }
 0x1de   : > { %vm1083_vm1 = vcmp.eq.s32.totalorder %v835_v14, %v5821_v16  ;;  %vm5170_vm2 = vmpackc.low %vm1088_vm13, %vm1084_vm14 }
 0x1df   : > { %vm5172_vm6 = vmpackc.low %vm1087_vm0, %vm1083_vm1 }
 0x1e0   : > { %v844_v15 = vpop.permute.xlu1 %843  ;;  %4052 = vmatmul.mubr.f32.gmra.mrb[22].mxu1 %v6462_v36  ;;  %v841_v17 = vpop.permute.xlu0 %840  ;;  %5169 = vmatpush1.bf16.msk.msra.mxu0 %vm5168_vm15, %v5414_v31 }
 0x1e1   : > { %vm1096_vm3 = vcmp.eq.s32.totalorder %v844_v15, %v5831_v23  ;;  %vm1092_vm5 = vcmp.eq.s32.totalorder %v841_v17, %v5831_v23  ;;  %5171 = vmatprep.subr.msk.bf16.mxu0 %vm5170_vm2, %v5414_v31  ;;  %4057 = vmatprep.mubr.f32.mxu1 %v6469_v41  ;;  %vm1095_vm7 = vcmp.eq.s32.totalorder %v844_v15, %v5821_v16 }
 0x1e2   : > { %vm1091_vm4 = vcmp.eq.s32.totalorder %v841_v17, %v5821_v16  ;;  %vm5174_vm8 = vmpackc.low %vm1096_vm3, %vm1092_vm5 }
 0x1e3   : > { %vm5176_vm11 = vmpackc.low %vm1095_vm7, %vm1091_vm4 }
 0x1e4   : > { %v850_v18 = vpop.permute.xlu1 %849  ;;  %4058 = vmatmul.mubr.f32.gmra.mrb[24].mxu1 %v6478_v45  ;;  %v847_v20 = vpop.permute.xlu0 %846  ;;  %5173 = vmatpush1.bf16.msk.msra.mxu0 %vm5172_vm6, %v5414_v31 }
 0x1e5   : > { %vm1104_vm9 = vcmp.eq.s32.totalorder %v850_v18, %v5831_v23  ;;  %vm1100_vm10 = vcmp.eq.s32.totalorder %v847_v20, %v5831_v23  ;;  %5175 = vmatprep.subr.msk.bf16.mxu0 %vm5174_vm8, %v5414_v31  ;;  %4063 = vmatprep.mubr.f32.mxu1 %v6485_v47  ;;  %vm1103_vm12 = vcmp.eq.s32.totalorder %v850_v18, %v5821_v16  ;;  %v2205_v23 = vld [vmem:[%s6331_s20 + $0x10] sm:$0xff] }
 0x1e6   : > { %vm1099_vm13 = vcmp.eq.s32.totalorder %v847_v20, %v5821_v16  ;;  %vm5178_vm14 = vmpackc.low %vm1104_vm9, %vm1100_vm10  ;;  %v2210_v16 = vld [vmem:[%s6331_s20 + $0x38] sm:$0xff] }
 0x1e7   : > { %vm5180_vm15 = vmpackc.low %vm1103_vm12, %vm1099_vm13 }
 0x1e8   : > { %4064 = vmatmul.mubr.f32.gmra.mrb[26].mxu1 %v6494_v51  ;;  %5177 = vmatpush1.bf16.msk.msra.mxu0 %vm5176_vm11, %v5414_v31 }
 0x1e9   : > { %5179 = vmatprep.subr.msk.bf16.mxu0 %vm5178_vm14, %v5414_v31  ;;  %4069 = vmatprep.mubr.f32.mxu1 %v6501_v53 }
 0x1ec   : > { %4070 = vmatmul.mubr.f32.gmra.mrb[28].mxu1 %v6510_v57  ;;  %5181 = vmatpush1.bf16.msk.msra.mxu0 %vm5180_vm15, %v5414_v31  ;;  %v2213_v31 = vld [vmem:[%s6331_s20 + $0x50] sm:$0xff] }
 0x1ed   : > { %4075 = vmatprep.mubr.f32.mxu1 %v6517_v59 }
 0x1ef   : > { %3921 = vmatmul.mubr.f32.vlgmr.msra.gmra.mrb[0].mxu0 %v2205_v23 }
 0x1f0   : > { %4076 = vmatmul.mubr.f32.gmra.mrb[30].mxu1 %v6526_v63  ;;  %3926 = vmatprep.mubr.f32.mxu0 %v2210_v16 }
 0x1f1   : > { %4146 = vmatprep.mubr.f32.mxu1 %v6533_v7 }
 0x1f3   : > { %3927 = vmatmul.mubr.f32.gmra.mrb[2].mxu0 %v2209_v21 }
 0x1f4   : > { %4147 = vmatmul.mubr.f32.vlgmr.msra.gmra.mrb[16].mxu1 %v2205_v23  ;;  %3932 = vmatprep.mubr.f32.mxu0 %v2214_v22 }
 0x1f5   : > { %4152 = vmatprep.mubr.f32.mxu1 %v2210_v16 }
 0x1f7   : > { %3933 = vmatmul.mubr.f32.gmra.mrb[4].mxu0 %v2213_v31 }
 0x1f8   : > { %4153 = vmatmul.mubr.f32.gmra.mrb[18].mxu1 %v2209_v21  ;;  %3938 = vmatprep.mubr.f32.mxu0 %v2218_v24 }
 0x1f9   : > { %4158 = vmatprep.mubr.f32.mxu1 %v2214_v22 }
 0x1fb   : > { %3939 = vmatmul.mubr.f32.gmra.mrb[6].mxu0 %v2217_v25 }
 0x1fc   : > { %4159 = vmatmul.mubr.f32.gmra.mrb[20].mxu1 %v2213_v31  ;;  %3944 = vmatprep.mubr.f32.mxu0 %v2222_v26 }
 0x1fd   : > { %4164 = vmatprep.mubr.f32.mxu1 %v2218_v24 }
 0x1ff   : > { %3945 = vmatmul.mubr.f32.gmra.mrb[8].mxu0 %v2221_v27 }
 0x200   : > { %4165 = vmatmul.mubr.f32.gmra.mrb[22].mxu1 %v2217_v25  ;;  %3950 = vmatprep.mubr.f32.mxu0 %v2226_v28 }
 0x201   : > { %4170 = vmatprep.mubr.f32.mxu1 %v2222_v26 }
 0x203   : > { %3951 = vmatmul.mubr.f32.gmra.mrb[10].mxu0 %v2225_v29 }
 0x204   : > { %4171 = vmatmul.mubr.f32.gmra.mrb[24].mxu1 %v2221_v27  ;;  %3956 = vmatprep.mubr.f32.mxu0 %v2230_v1 }
 0x205   : > { %4176 = vmatprep.mubr.f32.mxu1 %v2226_v28 }
 0x207   : > { %3957 = vmatmul.mubr.f32.gmra.mrb[12].mxu0 %v2229_v30 }
 0x208   : > { %4177 = vmatmul.mubr.f32.gmra.mrb[26].mxu1 %v2225_v29  ;;  %3962 = vmatprep.mubr.f32.mxu0 %v2234_v32 }
 0x209   : > { %4182 = vmatprep.mubr.f32.mxu1 %v2230_v1 }
 0x20b   : > { %3963 = vmatmul.mubr.f32.gmra.mrb[14].mxu0 %v2233_v33 }
 0x20c   : > { %4183 = vmatmul.mubr.f32.gmra.mrb[28].mxu1 %v2229_v30 }
 0x20d   : > { %4188 = vmatprep.mubr.f32.mxu1 %v2234_v32 }
 0x210   : > { %4189 = vmatmul.mubr.f32.gmra.mrb[30].mxu1 %v2233_v33 }
 0x247   : > { %v3357_v12 = vpop.f32.mrb[0].mxu1 }
 0x248   : > { %v3359_v35 = vpop.f32.mrb[1].mxu1 }
 0x24b   : > { %v3363_v37 = vpop.f32.mrb[2].mxu1 }
 0x24c   : > { %v3365_v39 = vpop.f32.mrb[3].mxu1 }
 0x24f   : > { %v3369_v40 = vpop.f32.mrb[4].mxu1 }
 0x250   : > { %v3371_v11 = vpop.f32.mrb[5].mxu1 }
 0x253   : > { %v3375_v42 = vpop.f32.mrb[6].mxu1 }
 0x254   : > { %v3377_v43 = vpop.f32.mrb[7].mxu1 }
 0x257   : > { %v3381_v44 = vpop.f32.mrb[8].mxu1 }
 0x258   : > { %v3383_v46 = vpop.f32.mrb[9].mxu1 }
 0x25b   : > { %v3387_v48 = vpop.f32.mrb[10].mxu1 }
 0x25c   : > { %v3389_v49 = vpop.f32.mrb[11].mxu1 }
 0x25f   : > { %v6616_v50 = vpop.f32.mrb[12].mxu1 }
 0x260   : > { %v6618_v34 = vpop.f32.mrb[13].mxu1 }
 0x263   : > { %v6620_v52 = vpop.f32.mrb[14].mxu1 }
 0x264   : > { %v6622_v54 = vpop.f32.mrb[15].mxu1 }
 0x2c2   : > { %v3922_v19 = vpop.f32.mrb[0].mxu0 }
 0x2c3   : > { %v5182_v55 = vadd.f32 %v3922_v19, %v3357_v12  ;;  %v3924_v36 = vpop.f32.mrb[1].mxu0 }
 0x2c4   : > { %v5183_v56 = vadd.f32 %v3924_v36, %v3359_v35 }
 0x2c5   : > { %4195 = vst [vmem:[%s6629_s7] sm:$0xff] %v5182_v55 }
 0x2c6   : > { %4196 = vst [vmem:[%s6629_s7 + $0x8] sm:$0xff] %v5183_v56  ;;  %v3928_v41 = vpop.f32.mrb[2].mxu0 }
 0x2c7   : > { %v5184_v58 = vadd.f32 %v3928_v41, %v3363_v37  ;;  %v4148_v45 = vpop.f32.mrb[16].mxu1  ;;  %v3930_v60 = vpop.f32.mrb[3].mxu0 }
 0x2c8   : > { %4197 = vst [vmem:[%s6629_s7 + $0x10] sm:$0xff] %v4148_v45  ;;  %v5185_v47 = vadd.f32 %v3930_v60, %v3365_v39  ;;  %v4150_v61 = vpop.f32.mrb[17].mxu1 }
 0x2c9   : > { %4199 = vst [vmem:[%s6629_s7 + $0x20] sm:$0xff] %v5184_v58  ;;  %4198 = vst [vmem:[%s6629_s7 + $0x18] sm:$0xff] %v4150_v61 }
 0x2ca   : > { %4200 = vst [vmem:[%s6629_s7 + $0x28] sm:$0xff] %v5185_v47  ;;  %v3934_v51 = vpop.f32.mrb[4].mxu0 }
 0x2cb   : > { %v5186_v62 = vadd.f32 %v3934_v51, %v3369_v40  ;;  %v4154_v53 = vpop.f32.mrb[18].mxu1  ;;  %v3936_v0 = vpop.f32.mrb[5].mxu0 }
 0x2cc   : > { %4201 = vst [vmem:[%s6629_s7 + $0x30] sm:$0xff] %v4154_v53  ;;  %v5187_v57 = vadd.f32 %v3936_v0, %v3371_v11  ;;  %v4156_v3 = vpop.f32.mrb[19].mxu1 }
 0x2cd   : > { %4203 = vst [vmem:[%s6629_s7 + $0x40] sm:$0xff] %v5186_v62  ;;  %4202 = vst [vmem:[%s6629_s7 + $0x38] sm:$0xff] %v4156_v3 }
 0x2ce   : > { %4204 = vst [vmem:[%s6629_s7 + $0x48] sm:$0xff] %v5187_v57  ;;  %v3940_v59 = vpop.f32.mrb[6].mxu0 }
 0x2cf   : > { %v5188_v4 = vadd.f32 %v3940_v59, %v3375_v42  ;;  %v4160_v63 = vpop.f32.mrb[20].mxu1  ;;  %v3942_v5 = vpop.f32.mrb[7].mxu0 }
 0x2d0   : > { %4205 = vst [vmem:[%s6629_s7 + $0x50] sm:$0xff] %v4160_v63  ;;  %v5189_v7 = vadd.f32 %v3942_v5, %v3377_v43  ;;  %v4162_v2 = vpop.f32.mrb[21].mxu1 }
 0x2d1   : > { %4207 = vst [vmem:[%s6629_s7 + $0x60] sm:$0xff] %v5188_v4  ;;  %4206 = vst [vmem:[%s6629_s7 + $0x58] sm:$0xff] %v4162_v2 }
 0x2d2   : > { %4208 = vst [vmem:[%s6629_s7 + $0x68] sm:$0xff] %v5189_v7  ;;  %v3946_v6 = vpop.f32.mrb[8].mxu0 }
 0x2d3   : > { %v5190_v8 = vadd.f32 %v3946_v6, %v3381_v44  ;;  %v4166_v9 = vpop.f32.mrb[22].mxu1  ;;  %v3948_v10 = vpop.f32.mrb[9].mxu0 }
 0x2d4   : > { %4209 = vst [vmem:[%s6629_s7 + $0x70] sm:$0xff] %v4166_v9  ;;  %v5191_v13 = vadd.f32 %v3948_v10, %v3383_v46  ;;  %v4168_v38 = vpop.f32.mrb[23].mxu1 }
 0x2d5   : > { %4211 = vst [vmem:[%s6629_s7 + $0x80] sm:$0xff] %v5190_v8  ;;  %4210 = vst [vmem:[%s6629_s7 + $0x78] sm:$0xff] %v4168_v38 }
 0x2d6   : > { %4212 = vst [vmem:[%s6629_s7 + $0x88] sm:$0xff] %v5191_v13  ;;  %v3952_v14 = vpop.f32.mrb[10].mxu0 }
 0x2d7   : > { %v5192_v15 = vadd.f32 %v3952_v14, %v3387_v48  ;;  %v4172_v17 = vpop.f32.mrb[24].mxu1  ;;  %v3954_v18 = vpop.f32.mrb[11].mxu0 }
 0x2d8   : > { %4213 = vst [vmem:[%s6629_s7 + $0x90] sm:$0xff] %v4172_v17  ;;  %v5193_v20 = vadd.f32 %v3954_v18, %v3389_v49  ;;  %v4174_v23 = vpop.f32.mrb[25].mxu1 }
 0x2d9   : > { %4215 = vst [vmem:[%s6629_s7 + $0xa0] sm:$0xff] %v5192_v15  ;;  %4214 = vst [vmem:[%s6629_s7 + $0x98] sm:$0xff] %v4174_v23 }
 0x2da   : > { %4216 = vst [vmem:[%s6629_s7 + $0xa8] sm:$0xff] %v5193_v20  ;;  %v3958_v16 = vpop.f32.mrb[12].mxu0 }
 0x2db   : > { %v5194_v21 = vadd.f32 %v3958_v16, %v6616_v50  ;;  %v4178_v22 = vpop.f32.mrb[26].mxu1  ;;  %v3960_v31 = vpop.f32.mrb[13].mxu0 }
 0x2dc   : > { %4217 = vst [vmem:[%s6629_s7 + $0xb0] sm:$0xff] %v4178_v22  ;;  %v5195_v24 = vadd.f32 %v3960_v31, %v6618_v34  ;;  %v4180_v25 = vpop.f32.mrb[27].mxu1 }
 0x2dd   : > { %4219 = vst [vmem:[%s6629_s7 + $0xc0] sm:$0xff] %v5194_v21  ;;  %4218 = vst [vmem:[%s6629_s7 + $0xb8] sm:$0xff] %v4180_v25 }
 0x2de   : > { %4220 = vst [vmem:[%s6629_s7 + $0xc8] sm:$0xff] %v5195_v24  ;;  %v3964_v26 = vpop.f32.mrb[14].mxu0 }
 0x2df   : > { %v5196_v27 = vadd.f32 %v3964_v26, %v6620_v52  ;;  %v4184_v28 = vpop.f32.mrb[28].mxu1  ;;  %v3966_v29 = vpop.f32.mrb[15].mxu0 }
 0x2e0   : > { %4221 = vst [vmem:[%s6629_s7 + $0xd0] sm:$0xff] %v4184_v28  ;;  %v5197_v1 = vadd.f32 %v3966_v29, %v6622_v54  ;;  %v4186_v30 = vpop.f32.mrb[29].mxu1 }
 0x2e1   : > { %4223 = vst [vmem:[%s6629_s7 + $0xe0] sm:$0xff] %v5196_v27  ;;  %4222 = vst [vmem:[%s6629_s7 + $0xd8] sm:$0xff] %v4186_v30 }
 0x2e2   : > { %4224 = vst [vmem:[%s6629_s7 + $0xe8] sm:$0xff] %v5197_v1 }
 0x2e3   : > { %v4190_v32 = vpop.f32.mrb[30].mxu1 }
 0x2e4   : > { %4225 = vst [vmem:[%s6629_s7 + $0xf0] sm:$0xff] %v4190_v32  ;;  %v4192_v33 = vpop.f32.mrb[31].mxu1 }
 0x2e5   : > { %4226 = vst [vmem:[%s6629_s7 + $0xf8] sm:$0xff] %v4192_v33 }
 0x2e6 PF: > { %s21_s28 = sadd.s32 1, %s5410_s28   ;;  %s6696_s23 = smov %s5390_s24 }
 0x2e7   : > { %p18_p6 = scmp.ge.s32.totalorder %s21_s28, 4   ;;  %s6697_s24 = smov %s5510_s18 }
 0x2e8   : > { %s6698_s25 = smov %s5398_s0  ;;  %s6699_s0 = smov %s5507_s17 }
 0x2e9   : > { %s6700_s26 = smov %s5406_s27  ;;  %s6701_s27 = smov %s6703_s29 }
 0x2ea   :  { %20 = sbr.rel (!%p18_p6) target bundleno = 19 (0x13), region = 131 }

</bundles_post_ra>
